<compile_context>
chip_gen: v7x
topology: tpu7x:2x2x1
jax: 0.10.0
libtpu: 0.0.40
codegen_flags: <defaults>
</compile_context>

<pallas_src>
import math
import functools

import jax
import jax.numpy as jnp
from jax.experimental import pallas as pl
from jax.experimental.pallas import tpu as pltpu


# ----------------------------- small helpers -----------------------------------------

def _layer_norm(x, gamma, beta, eps=1e-5):
    mu = jnp.mean(x, axis=-1, keepdims=True)
    xc = x - mu
    var = jnp.mean(xc * xc, axis=-1, keepdims=True)
    return xc * jax.lax.rsqrt(var + eps) * gamma + beta


def _pb(shape, itemsize):
    """Rough padded-tile byte count of an array in VMEM."""
    s = list(shape)
    if not s:
        return itemsize
    s[-1] = -(-s[-1] // 128) * 128
    if len(s) >= 2:
        sub = 8 if itemsize >= 4 else (16 if itemsize == 2 else 32)
        s[-2] = -(-s[-2] // sub) * sub
    n = 1
    for d in s:
        n *= d
    return n * itemsize


def _chip_info():
    """(physical VMEM bytes, #TensorCores) with conservative fallbacks."""
    try:
        info = pltpu.get_tpu_info()
        vmem = int(info.vmem_capacity_bytes)
        return vmem, (2 if vmem <= (64 << 20) else 1)
    except Exception:
        pass
    try:
        kind = jax.devices()[0].device_kind.lower()
    except Exception:
        kind = ""
    if any(t in kind for t in ("v6", "v5", "v4")):
        return 128 << 20, 1
    return 64 << 20, 2          # unknown / v7x-class: be conservative on VMEM


def _weights_vmem_bytes(d, f, h):
    dh = d // h
    return (_pb((d, 3 * d), 2) + _pb((1, 3 * d), 4)
            + _pb((h, dh, d), 2) + _pb((1, d), 4)
            + _pb((d, f), 2) + _pb((1, f), 4)
            + _pb((f, d), 2) + _pb((1, d), 4)
            + 4 * _pb((1, d), 4))


def _vmem_need(tb, seq, d, h, f, sqm, kv_tile, with_attn, weights_bytes, weight_bufs):
    m = tb * seq
    dh = d // h
    kv = seq if kv_tile is None else kv_tile
    n = 0
    n += 2 * _pb((tb, seq, d), 4)                 # x block (double buffered)
    n += 2 * _pb((tb, sqm, seq), 4)               # bias block
    n += 2 * _pb((tb, seq, d), 4)                 # out block
    if with_attn:
        n += 2 * _pb((h, tb, seq, seq), 4)        # attention-prob output block
    n += weight_bufs * weights_bytes              # resident weights
    n += _pb((m, 3 * d), 4) + _pb((m, 3 * d), 2)  # qkv f32 result + bf16 copy
    n += 3 * _pb((h * tb, seq, dh), 2)            # q, k, v
    n += 3 * _pb((h * tb, seq, kv), 4)            # scores / exp / probs
    n += 2 * _pb((h * tb, seq, dh), 4)            # context / online accumulator
    n += 3 * _pb((m, d), 4)                       # attn_out / h1 / residual temps
    n += _pb((m, f), 4) + _pb((m, f), 2) + _pb((m, d), 2)
    return n


def _auto_kv_tile(seq, num_heads):
    if num_heads * seq * seq * 4 <= (4 << 20):
        return None
    for t in (512, 256, 128):
        if seq % t == 0 and seq > t:
            return t
    return None


def _pick_tile_b(batch, seq, d, h, f, sqm, kv_tile, with_attn,
                 weights_bytes, n_tc, budget):
    # TB > 1 only when S is 16-aligned so the bf16/f32 row merges inside the kernel
    # stay tile-aligned.  On 2-TC chips keep >= n_tc grid steps (when batch allows)
    # so both TensorCores get work; on single-TC chips just grow TB to the budget.
    if seq % 16 != 0:
        return 1
    best = 1
    for cand in range(1, batch + 1):
        if batch % cand:
            continue
        if n_tc > 1 and batch >= n_tc and (batch // cand) < n_tc:
            continue
        if _vmem_need(cand, seq, d, h, f, sqm, kv_tile, with_attn,
                      weights_bytes, 1) > budget:
            continue
        best = cand
    return best


# ----------------------------- fused encoder-layer kernel ----------------------------

def encoder_layer_kernel(x_ref, bias_ref,
                         wqkv_ref, bqkv_ref, wo_ref, bo_ref,
                         ln1_g_ref, ln1_b_ref,
                         w1_ref, b1_ref, w2_ref, b2_ref,
                         ln2_g_ref, ln2_b_ref,
                         out_ref, *attn_refs,
                         num_heads, head_dim, kv_tile):
    H, dh = num_heads, head_dim
    TB, S, D = out_ref.shape
    M = TB * S
    HB = H * TB
    scale = 1.0 / math.sqrt(dh)

    x_f32 = x_ref[...].reshape(M, D)              # f32 residual stream
    x_bf = x_f32.astype(jnp.bfloat16)

    # fused QKV projection: one wide bf16 MXU matmul, f32 accumulate, bf16 once.
    qkv = (jnp.dot(x_bf, wqkv_ref[...], preferred_element_type=jnp.float32)
           + bqkv_ref[...]).astype(jnp.bfloat16)                       # (M, 3D)

    def split_heads(base):                         # bf16 head-major (HB, S, dh)
        parts = [qkv[:, base + h * dh: base + (h + 1) * dh].reshape(TB, S, dh)
                 for h in range(H)]
        return jnp.stack(parts, axis=0).reshape(HB, S, dh)

    q = split_heads(0)
    k = split_heads(D)
    v = split_heads(2 * D)

    bias = bias_ref[...]                           # (TB, SQM, S) f32, SQM in {1, S}

    def add_bias(scores, b):
        # implicit broadcast over heads (leading dim) and queries (sublane);
        # never materialized as an (H, TB, S, S) array.
        hb, sq, sk = scores.shape
        return (scores.reshape(H, TB, sq, sk) + b[None]).reshape(hb, sq, sk)

    if kv_tile is None or attn_refs:
        # full-scores path (also used whenever attention probabilities are returned)
        s = jnp.einsum('bqd,bkd->bqk', q, k,
                       preferred_element_type=jnp.float32) * scale
        s = add_bias(s, bias)
        m = jnp.max(s, axis=-1, keepdims=True)
        e = jnp.exp(s - m)
        l = jnp.sum(e, axis=-1, keepdims=True)
        if attn_refs:
            p = e / l                               # exact probabilities for the output
            attn_refs[0][...] = p.reshape(H, TB, S, S)
        else:
            p = e * pl.reciprocal(l, approx=True)   # EUP slot
        ctx = jnp.einsum('bqk,bkd->bqd', p.astype(jnp.bfloat16), v,
                         preferred_element_type=jnp.float32)           # (HB, S, dh)
    else:
        # flash-style online softmax over key tiles: attention VMEM O(S * kv_tile)
        m_i = jnp.full((HB, S, 1), -1e30, dtype=jnp.float32)
        l_i = jnp.zeros((HB, S, 1), dtype=jnp.float32)
        acc = jnp.zeros((HB, S, dh), dtype=jnp.float32)
        for t in range(S // kv_tile):
            k0 = t * kv_tile
            k_t = k[:, k0:k0 + kv_tile, :]
            v_t = v[:, k0:k0 + kv_tile, :]
            s_t = jnp.einsum('bqd,bkd->bqk', q, k_t,
                             preferred_element_type=jnp.float32) * scale
            s_t = add_bias(s_t, bias[:, :, k0:k0 + kv_tile])
            m_new = jnp.maximum(m_i, jnp.max(s_t, axis=-1, keepdims=True))
            alpha = jnp.exp(m_i - m_new)
            p_t = jnp.exp(s_t - m_new)
            l_i = alpha * l_i + jnp.sum(p_t, axis=-1, keepdims=True)
            acc = alpha * acc + jnp.einsum('bqk,bkd->bqd',
                                           p_t.astype(jnp.bfloat16), v_t,
                                           preferred_element_type=jnp.float32)
            m_i = m_new
        ctx = acc * pl.reciprocal(l_i, approx=True)                    # (HB, S, dh)

    # output projection: per-head (M, dh)@(dh, D) accumulated into one (M, D) f32
    # accumulator -- no (H, M, D) f32 intermediate.
    ctx_bf = ctx.astype(jnp.bfloat16).reshape(H, M, dh)
    attn_out = jnp.dot(ctx_bf[0], wo_ref[0], preferred_element_type=jnp.float32)
    for h in range(1, H):
        attn_out = attn_out + jnp.dot(ctx_bf[h], wo_ref[h],
                                      preferred_element_type=jnp.float32)
    attn_out = attn_out + bo_ref[...]

    # dropout (p=0.1) is identity in eval mode
    h1 = _layer_norm(x_f32 + attn_out, ln1_g_ref[...], ln1_b_ref[...])

    # position-wise feed-forward
    f = jnp.dot(h1.astype(jnp.bfloat16), w1_ref[...],
                preferred_element_type=jnp.float32) + b1_ref[...]
    f = jnp.maximum(f, 0.0)
    f = jnp.dot(f.astype(jnp.bfloat16), w2_ref[...],
                preferred_element_type=jnp.float32) + b2_ref[...]
    out = _layer_norm(h1 + f, ln2_g_ref[...], ln2_b_ref[...])
    out_ref[...] = out.reshape(TB, S, D).astype(out_ref.dtype)


# ----------------------------- pallas_call construction ------------------------------

def _build_layer_call(B, S, D, F, SQM, num_heads, return_attention, kv_tile,
                      chip, weight_buffered):
    dh = D // num_heads
    vmem_phys, n_tc = chip
    weights_bytes = _weights_vmem_bytes(D, F, num_heads)
    budget = vmem_phys // 2
    TB = _pick_tile_b(B, S, D, num_heads, F, SQM, kv_tile, return_attention,
                      weights_bytes, n_tc, budget)
    grid = (B // TB,)

    need = _vmem_need(TB, S, D, num_heads, F, SQM, kv_tile, return_attention,
                      weights_bytes, 1 if weight_buffered else 2)
    cap = max(vmem_phys - (8 << 20), 32 << 20)
    vmem_limit = int(min(max(2 * need + (4 << 20), 32 << 20), cap))

    flops = 2 * B * S * D * (4 * D + 2 * F) + 4 * B * S * S * D
    trans = B * num_heads * S * S + 2 * B * S
    bytes_acc = (2 * B * S * D * 4 + B * SQM * S * 4 + weights_bytes
                 + (num_heads * B * S * S * 4 if return_attention else 0))

    def wspec(shape):
        kw = {}
        if weight_buffered:
            kw["pipeline_mode"] = pl.Buffered(1)    # weights never change block index
        return pl.BlockSpec(shape, lambda *i, n=len(shape): (0,) * n, **kw)

    in_specs = [
        pl.BlockSpec((TB, S, D), lambda i: (i, 0, 0)),     # x
        pl.BlockSpec((TB, SQM, S), lambda i: (i, 0, 0)),   # additive attention bias
        wspec((D, 3 * D)), wspec((1, 3 * D)),              # fused Wqkv (bf16), bqkv
        wspec((num_heads, dh, D)), wspec((1, D)),          # Wo (head-major, bf16), bo
        wspec((1, D)), wspec((1, D)),                      # ln1 gamma, beta
        wspec((D, F)), wspec((1, F)),                      # W1 (bf16), b1
        wspec((F, D)), wspec((1, D)),                      # W2 (bf16), b2
        wspec((1, D)), wspec((1, D)),                      # ln2 gamma, beta
    ]
    out_spec = pl.BlockSpec((TB, S, D), lambda i: (i, 0, 0))
    if return_attention:
        out_shape = (jax.ShapeDtypeStruct((B, S, D), jnp.float32),
                     jax.ShapeDtypeStruct((num_heads, B, S, S), jnp.float32))
        out_specs = (out_spec,
                     pl.BlockSpec((num_heads, TB, S, S), lambda i: (0, i, 0, 0)))
    else:
        out_shape = jax.ShapeDtypeStruct((B, S, D), jnp.float32)
        out_specs = out_spec

    kernel = functools.partial(encoder_layer_kernel, num_heads=num_heads,
                               head_dim=dh, kv_tile=kv_tile)
    call = pl.pallas_call(
        kernel,
        out_shape=out_shape,
        grid=grid,
        in_specs=in_specs,
        out_specs=out_specs,
        compiler_params=pltpu.CompilerParams(
            dimension_semantics=("parallel",),
            vmem_limit_bytes=vmem_limit),
        cost_estimate=pl.CostEstimate(flops=int(flops),
                                      transcendentals=int(trans),
                                      bytes_accessed=int(bytes_acc)),
    )
    return jax.jit(call)


def _layer_args(x, attn_bias, params, num_heads):
    D = x.shape[-1]
    dh = D // num_heads
    wqkv = jnp.concatenate([params["wq"], params["wk"], params["wv"]],
                           axis=1).astype(jnp.bfloat16)           # (D, 3D)
    bqkv = jnp.concatenate([params["bq"], params["bk"], params["bv"]], axis=1)
    wo_h = params["wo"].reshape(num_heads, dh, D).astype(jnp.bfloat16)
    return (x, attn_bias, wqkv, bqkv, wo_h, params["bo"],
            params["ln1_g"], params["ln1_b"],
            params["w1"].astype(jnp.bfloat16), params["b1"],
            params["w2"].astype(jnp.bfloat16), params["b2"],
            params["ln2_g"], params["ln2_b"])


def encoder(src_seq, src_mask, layer_params, *, num_heads,
            return_attentions=False, kv_tile=None):
    """src_seq: (B, S, D) f32.  src_mask: (B, S), (B, 1, S) or (B, S, S); 1.0 = masked."""
    B, S, D = src_seq.shape
    F = layer_params[0]["w1"].shape[1]

    mask = src_mask.astype(jnp.float32)
    if mask.ndim == 2:
        mask = mask[:, None, :]
    SQM = mask.shape[1]
    attn_bias = mask * jnp.float32(-1e9)           # additive mask, computed once

    chip = _chip_info()
    if return_attentions:
        kv_tile = None                              # full probs must be materialized
    elif kv_tile is None:
        kv_tile = _auto_kv_tile(S, num_heads)
    elif (S % kv_tile) or (kv_tile % 8):
        kv_tile = None

    build = functools.partial(_build_layer_call, B, S, D, F, SQM, num_heads,
                              return_attentions, kv_tile, chip)
    call = build(True)
    fell_back = False

    enc_output = src_seq
    attentions = []
    for params in layer_params:
        args = _layer_args(enc_output, attn_bias, params, num_heads)
        if not fell_back:
            try:
                result = call(*args)
            except Exception:
                # pl.Buffered(1) single-buffered weights unsupported on this
                # jax/libtpu combo -> fall back to default double buffering.
                fell_back = True
                call = build(False)
                result = call(*args)
        else:
            result = call(*args)
        if return_attentions:
            enc_output, attn = result
            attentions.append(jnp.transpose(attn, (1, 0, 2, 3)))   # -> (B, H, S, S)
        else:
            enc_output = result
    if return_attentions:
        return enc_output, attentions
    return enc_output


# ----------------------------- pure-JAX reference (precision-matched) ----------------

def _mm(a, b):
    return jnp.dot(a.astype(jnp.bfloat16), b.astype(jnp.bfloat16),
                   preferred_element_type=jnp.float32)


def encoder_ref(src_seq, src_mask, layer_params, *, num_heads):
    mask = src_mask.astype(jnp.float32)
    if mask.ndim == 2:
        mask = mask[:, None, :]
    bias = mask * jnp.float32(-1e9)
    x = src_seq
    attns = []
    for p in layer_params:
        B, S, D = x.shape
        dh = D // num_heads
        q = _mm(x, p["wq"]) + p["bq"]
        k = _mm(x, p["wk"]) + p["bk"]
        v = _mm(x, p["wv"]) + p["bv"]

        def split(t):
            return jnp.transpose(t.reshape(B, S, num_heads, dh), (0, 2, 1, 3))
        q, k, v = split(q), split(k), split(v)
        s = jnp.einsum('bhqd,bhkd->bhqk', q.astype(jnp.bfloat16),
                       k.astype(jnp.bfloat16),
                       preferred_element_type=jnp.float32) / math.sqrt(dh)
        s = s + bias[:, None, :, :]
        attn = jax.nn.softmax(s, axis=-1)
        ctx = jnp.einsum('bhqk,bhkd->bhqd', attn.astype(jnp.bfloat16),
                         v.astype(jnp.bfloat16),
                         preferred_element_type=jnp.float32)
        ctx = jnp.transpose(ctx, (0, 2, 1, 3)).reshape(B, S, D)
        ao = _mm(ctx, p["wo"]) + p["bo"]
        h1 = _layer_norm(x + ao, p["ln1_g"], p["ln1_b"])
        f = jnp.maximum(_mm(h1, p["w1"]) + p["b1"], 0.0)
        f = _mm(f, p["w2"]) + p["b2"]
        x = _layer_norm(h1 + f, p["ln2_g"], p["ln2_b"])
        attns.append(attn)
    return x, attns


# ----------------------------- parameter init ----------------------------------------

def init_layer_params(key, model_dim, ff_dim):
    ks = jax.random.split(key, 6)
    s_d = 1.0 / math.sqrt(model_dim)
    s_f = 1.0 / math.sqrt(ff_dim)
    return {
        "wq": jax.random.normal(ks[0], (model_dim, model_dim), jnp.float32) * s_d,
        "bq": jnp.zeros((1, model_dim), jnp.float32),
        "wk": jax.random.normal(ks[1], (model_dim, model_dim), jnp.float32) * s_d,
        "bk": jnp.zeros((1, model_dim), jnp.float32),
        "wv": jax.random.normal(ks[2], (model_dim, model_dim), jnp.float32) * s_d,
        "bv": jnp.zeros((1, model_dim), jnp.float32),
        "wo": jax.random.normal(ks[3], (model_dim, model_dim), jnp.float32) * s_d,
        "bo": jnp.zeros((1, model_dim), jnp.float32),
        "ln1_g": jnp.ones((1, model_dim), jnp.float32),
        "ln1_b": jnp.zeros((1, model_dim), jnp.float32),
        "w1": jax.random.normal(ks[4], (model_dim, ff_dim), jnp.float32) * s_d,
        "b1": jnp.zeros((1, ff_dim), jnp.float32),
        "w2": jax.random.normal(ks[5], (ff_dim, model_dim), jnp.float32) * s_f,
        "b2": jnp.zeros((1, model_dim), jnp.float32),
        "ln2_g": jnp.ones((1, model_dim), jnp.float32),
        "ln2_b": jnp.zeros((1, model_dim), jnp.float32),
    }


# ----------------------------- demo / self-check --------------------------------------

if __name__ == "__main__":
    B, S, D, H, F, L = 2, 8, 32, 4, 64, 6

    key = jax.random.PRNGKey(0)
    k_x, k_p, k_x2 = jax.random.split(key, 3)
    src_seq = jax.random.normal(k_x, (B, S, D), jnp.float32)

    # key-padding mask (1.0 = masked): last 2 key positions of batch element 1
    src_mask = jnp.zeros((B, 1, S), jnp.float32).at[1, 0, -2:].set(1.0)

    layer_params = [init_layer_params(k, D, F) for k in jax.random.split(k_p, L)]

    # default path (no attention-probability HBM stream)
    out = encoder(src_seq, src_mask, layer_params, num_heads=H)
    jax.block_until_ready(out)
    out_ref, attn_ref = encoder_ref(src_seq, src_mask, layer_params, num_heads=H)
    assert out.shape == (B, S, D) and bool(jnp.all(jnp.isfinite(out)))
    err = float(jnp.max(jnp.abs(out - out_ref)))
    assert err < 0.1, f"encoder output mismatch vs reference: {err}"

    # module semantics with returned attentions (exact softmax on this path)
    out2, attns = encoder(src_seq, src_mask, layer_params, num_heads=H,
                          return_attentions=True)
    jax.block_until_ready((out2, attns))
    assert len(attns) == L and attns[0].shape == (B, H, S, S)
    a_err = float(jnp.max(jnp.abs(attns[0] - attn_ref[0])))
    assert a_err < 1e-2, f"attention mismatch vs reference: {a_err}"
    assert float(jnp.max(attns[0][1, :, :, -2:])) < 1e-6   # masked keys ~= 0 prob

    # flash-style kv-tiled attention path on a longer sequence
    S2 = 128
    x2 = jax.random.normal(k_x2, (B, S2, D), jnp.float32)
    mask2 = jnp.zeros((B, 1, S2), jnp.float32).at[1, 0, -16:].set(1.0)
    out3 = encoder(x2, mask2, layer_params, num_heads=H, kv_tile=64)
    jax.block_until_ready(out3)
    out3_ref, _ = encoder_ref(x2, mask2, layer_params, num_heads=H)
    assert bool(jnp.all(jnp.isfinite(out3)))
    err3 = float(jnp.max(jnp.abs(out3 - out3_ref)))
    assert err3 < 0.1, f"kv-tiled encoder output mismatch vs reference: {err3}"

    print("KERNEL_OK")
</pallas_src>

<mosaic_0001>
module attributes {stable_mosaic.version = 11 : i64} {
  func.func @encoder_layer_kernel(%arg0: i32, %arg1: memref<1x8x32xf32, #tpu.memory_space<vmem>>, %arg2: memref<1x1x8xf32, #tpu.memory_space<vmem>>, %arg3: memref<32x96xbf16, #tpu.memory_space<vmem>>, %arg4: memref<1x96xf32, #tpu.memory_space<vmem>>, %arg5: memref<4x8x32xbf16, #tpu.memory_space<vmem>>, %arg6: memref<1x32xf32, #tpu.memory_space<vmem>>, %arg7: memref<1x32xf32, #tpu.memory_space<vmem>>, %arg8: memref<1x32xf32, #tpu.memory_space<vmem>>, %arg9: memref<32x64xbf16, #tpu.memory_space<vmem>>, %arg10: memref<1x64xf32, #tpu.memory_space<vmem>>, %arg11: memref<64x32xbf16, #tpu.memory_space<vmem>>, %arg12: memref<1x32xf32, #tpu.memory_space<vmem>>, %arg13: memref<1x32xf32, #tpu.memory_space<vmem>>, %arg14: memref<1x32xf32, #tpu.memory_space<vmem>>, %arg15: memref<1x8x32xf32, #tpu.memory_space<vmem>>) attributes {dimension_semantics = [#tpu.dimension_semantics<parallel>], iteration_bounds = array<i64: 2>, scalar_prefetch = 0 : i64, scratch_operands = 0 : i64, tpu.core_type = #tpu.core_type<tc>, window_params = [{transform_indices = @transform_0, window_bounds = array<i64: 1, 8, 32>}, {transform_indices = @transform_1, window_bounds = array<i64: 1, 1, 8>}, {pipeline_mode = #tpu.pipeline_mode<synchronous>, transform_indices = @transform_2, window_bounds = array<i64: 32, 96>}, {pipeline_mode = #tpu.pipeline_mode<synchronous>, transform_indices = @transform_3, window_bounds = array<i64: 1, 96>}, {pipeline_mode = #tpu.pipeline_mode<synchronous>, transform_indices = @transform_4, window_bounds = array<i64: 4, 8, 32>}, {pipeline_mode = #tpu.pipeline_mode<synchronous>, transform_indices = @transform_5, window_bounds = array<i64: 1, 32>}, {pipeline_mode = #tpu.pipeline_mode<synchronous>, transform_indices = @transform_6, window_bounds = array<i64: 1, 32>}, {pipeline_mode = #tpu.pipeline_mode<synchronous>, transform_indices = @transform_7, window_bounds = array<i64: 1, 32>}, {pipeline_mode = #tpu.pipeline_mode<synchronous>, transform_indices = @transform_8, window_bounds = array<i64: 32, 64>}, {pipeline_mode = #tpu.pipeline_mode<synchronous>, transform_indices = @transform_9, window_bounds = array<i64: 1, 64>}, {pipeline_mode = #tpu.pipeline_mode<synchronous>, transform_indices = @transform_10, window_bounds = array<i64: 64, 32>}, {pipeline_mode = #tpu.pipeline_mode<synchronous>, transform_indices = @transform_11, window_bounds = array<i64: 1, 32>}, {pipeline_mode = #tpu.pipeline_mode<synchronous>, transform_indices = @transform_12, window_bounds = array<i64: 1, 32>}, {pipeline_mode = #tpu.pipeline_mode<synchronous>, transform_indices = @transform_13, window_bounds = array<i64: 1, 32>}, {transform_indices = @transform_14, window_bounds = array<i64: 1, 8, 32>}]} {
    %c0 = arith.constant 0 : index
    %c0_0 = arith.constant 0 : index
    %c0_1 = arith.constant 0 : index
    %0 = vector.load %arg1[%c0, %c0_0, %c0_1] : memref<1x8x32xf32, #tpu.memory_space<vmem>>, vector<1x8x32xf32>
    %1 = vector.shape_cast %0 : vector<1x8x32xf32> to vector<8x32xf32>
    %2 = arith.truncf %1 : vector<8x32xf32> to vector<8x32xbf16>
    %c0_2 = arith.constant 0 : index
    %c0_3 = arith.constant 0 : index
    %3 = vector.load %arg3[%c0_2, %c0_3] : memref<32x96xbf16, #tpu.memory_space<vmem>>, vector<32x96xbf16>
    %cst = arith.constant dense<0.000000e+00> : vector<8x96xf32>
    %4 = tpu.matmul %2, %3, %cst {dimension_numbers = #tpu.dot_dimension_numbers<[1], [0], [0], [1], [0, 0, 1, 1], [], []>} : vector<8x32xbf16>, vector<32x96xbf16>, vector<8x96xf32> -> vector<8x96xf32>
    %c0_4 = arith.constant 0 : index
    %c0_5 = arith.constant 0 : index
    %5 = vector.load %arg4[%c0_4, %c0_5] : memref<1x96xf32, #tpu.memory_space<vmem>>, vector<1x96xf32>
    %6 = vector.broadcast %5 : vector<1x96xf32> to vector<8x96xf32>
    %7 = arith.addf %4, %6 : vector<8x96xf32>
    %8 = arith.truncf %7 : vector<8x96xf32> to vector<8x96xbf16>
    %9 = vector.extract_strided_slice %8 {offsets = [0, 0], sizes = [8, 8], strides = [1, 1]} : vector<8x96xbf16> to vector<8x8xbf16>
    %10 = vector.shape_cast %9 : vector<8x8xbf16> to vector<1x8x8xbf16>
    %11 = vector.extract_strided_slice %8 {offsets = [0, 8], sizes = [8, 8], strides = [1, 1]} : vector<8x96xbf16> to vector<8x8xbf16>
    %12 = vector.shape_cast %11 : vector<8x8xbf16> to vector<1x8x8xbf16>
    %13 = vector.extract_strided_slice %8 {offsets = [0, 16], sizes = [8, 8], strides = [1, 1]} : vector<8x96xbf16> to vector<8x8xbf16>
    %14 = vector.shape_cast %13 : vector<8x8xbf16> to vector<1x8x8xbf16>
    %15 = vector.extract_strided_slice %8 {offsets = [0, 24], sizes = [8, 8], strides = [1, 1]} : vector<8x96xbf16> to vector<8x8xbf16>
    %16 = vector.shape_cast %15 : vector<8x8xbf16> to vector<1x8x8xbf16>
    %17 = vector.shape_cast %10 : vector<1x8x8xbf16> to vector<1x1x8x8xbf16>
    %18 = vector.shape_cast %12 : vector<1x8x8xbf16> to vector<1x1x8x8xbf16>
    %19 = vector.shape_cast %14 : vector<1x8x8xbf16> to vector<1x1x8x8xbf16>
    %20 = vector.shape_cast %16 : vector<1x8x8xbf16> to vector<1x1x8x8xbf16>
    %21 = tpu.concatenate %17, %18, %19, %20 in 0 : vector<1x1x8x8xbf16>, vector<1x1x8x8xbf16>, vector<1x1x8x8xbf16>, vector<1x1x8x8xbf16> -> vector<4x1x8x8xbf16>
    %22 = vector.shape_cast %21 : vector<4x1x8x8xbf16> to vector<4x8x8xbf16>
    %23 = vector.extract_strided_slice %8 {offsets = [0, 32], sizes = [8, 8], strides = [1, 1]} : vector<8x96xbf16> to vector<8x8xbf16>
    %24 = vector.shape_cast %23 : vector<8x8xbf16> to vector<1x8x8xbf16>
    %25 = vector.extract_strided_slice %8 {offsets = [0, 40], sizes = [8, 8], strides = [1, 1]} : vector<8x96xbf16> to vector<8x8xbf16>
    %26 = vector.shape_cast %25 : vector<8x8xbf16> to vector<1x8x8xbf16>
    %27 = vector.extract_strided_slice %8 {offsets = [0, 48], sizes = [8, 8], strides = [1, 1]} : vector<8x96xbf16> to vector<8x8xbf16>
    %28 = vector.shape_cast %27 : vector<8x8xbf16> to vector<1x8x8xbf16>
    %29 = vector.extract_strided_slice %8 {offsets = [0, 56], sizes = [8, 8], strides = [1, 1]} : vector<8x96xbf16> to vector<8x8xbf16>
    %30 = vector.shape_cast %29 : vector<8x8xbf16> to vector<1x8x8xbf16>
    %31 = vector.shape_cast %24 : vector<1x8x8xbf16> to vector<1x1x8x8xbf16>
    %32 = vector.shape_cast %26 : vector<1x8x8xbf16> to vector<1x1x8x8xbf16>
    %33 = vector.shape_cast %28 : vector<1x8x8xbf16> to vector<1x1x8x8xbf16>
    %34 = vector.shape_cast %30 : vector<1x8x8xbf16> to vector<1x1x8x8xbf16>
    %35 = tpu.concatenate %31, %32, %33, %34 in 0 : vector<1x1x8x8xbf16>, vector<1x1x8x8xbf16>, vector<1x1x8x8xbf16>, vector<1x1x8x8xbf16> -> vector<4x1x8x8xbf16>
    %36 = vector.shape_cast %35 : vector<4x1x8x8xbf16> to vector<4x8x8xbf16>
    %37 = vector.extract_strided_slice %8 {offsets = [0, 64], sizes = [8, 8], strides = [1, 1]} : vector<8x96xbf16> to vector<8x8xbf16>
    %38 = vector.shape_cast %37 : vector<8x8xbf16> to vector<1x8x8xbf16>
    %39 = vector.extract_strided_slice %8 {offsets = [0, 72], sizes = [8, 8], strides = [1, 1]} : vector<8x96xbf16> to vector<8x8xbf16>
    %40 = vector.shape_cast %39 : vector<8x8xbf16> to vector<1x8x8xbf16>
    %41 = vector.extract_strided_slice %8 {offsets = [0, 80], sizes = [8, 8], strides = [1, 1]} : vector<8x96xbf16> to vector<8x8xbf16>
    %42 = vector.shape_cast %41 : vector<8x8xbf16> to vector<1x8x8xbf16>
    %43 = vector.extract_strided_slice %8 {offsets = [0, 88], sizes = [8, 8], strides = [1, 1]} : vector<8x96xbf16> to vector<8x8xbf16>
    %44 = vector.shape_cast %43 : vector<8x8xbf16> to vector<1x8x8xbf16>
    %45 = vector.shape_cast %38 : vector<1x8x8xbf16> to vector<1x1x8x8xbf16>
    %46 = vector.shape_cast %40 : vector<1x8x8xbf16> to vector<1x1x8x8xbf16>
    %47 = vector.shape_cast %42 : vector<1x8x8xbf16> to vector<1x1x8x8xbf16>
    %48 = vector.shape_cast %44 : vector<1x8x8xbf16> to vector<1x1x8x8xbf16>
    %49 = tpu.concatenate %45, %46, %47, %48 in 0 : vector<1x1x8x8xbf16>, vector<1x1x8x8xbf16>, vector<1x1x8x8xbf16>, vector<1x1x8x8xbf16> -> vector<4x1x8x8xbf16>
    %50 = vector.shape_cast %49 : vector<4x1x8x8xbf16> to vector<4x8x8xbf16>
    %c0_6 = arith.constant 0 : index
    %c0_7 = arith.constant 0 : index
    %c0_8 = arith.constant 0 : index
    %51 = vector.load %arg2[%c0_6, %c0_7, %c0_8] : memref<1x1x8xf32, #tpu.memory_space<vmem>>, vector<1x1x8xf32>
    "tpu.trace_start"() <{level = 10 : i32, message = "bqd,bkd->bqk"}> : () -> ()
    %cst_9 = arith.constant dense<0.000000e+00> : vector<4x8x8xf32>
    %52 = tpu.matmul %22, %36, %cst_9 {dimension_numbers = #tpu.dot_dimension_numbers<[2], [2], [1], [1], [0, 0, 0, 1, 1, 1], [0], [0]>} : vector<4x8x8xbf16>, vector<4x8x8xbf16>, vector<4x8x8xf32> -> vector<4x8x8xf32>
    "tpu.trace_stop"() : () -> ()
    %cst_10 = arith.constant 0.353553385 : f32
    %53 = vector.broadcast %cst_10 : f32 to vector<4x8x8xf32>
    %54 = arith.mulf %52, %53 : vector<4x8x8xf32>
    %55 = vector.shape_cast %54 : vector<4x8x8xf32> to vector<4x1x8x8xf32>
    %56 = vector.shape_cast %51 : vector<1x1x8xf32> to vector<1x1x1x8xf32>
    %57 = vector.broadcast %56 : vector<1x1x1x8xf32> to vector<4x1x8x8xf32>
    %58 = arith.addf %55, %57 : vector<4x1x8x8xf32>
    %59 = vector.shape_cast %58 : vector<4x1x8x8xf32> to vector<4x8x8xf32>
    %cst_11 = arith.constant dense<0xFF800000> : vector<4x8xf32>
    %60 = vector.multi_reduction <maximumf>, %59, %cst_11 [2] : vector<4x8x8xf32> to vector<4x8xf32>
    %61 = vector.shape_cast %60 : vector<4x8xf32> to vector<4x8x1xf32>
    %62 = vector.broadcast %61 : vector<4x8x1xf32> to vector<4x8x8xf32>
    %63 = arith.subf %59, %62 : vector<4x8x8xf32>
    %64 = math.exp %63 : vector<4x8x8xf32>
    %cst_12 = arith.constant dense<0.000000e+00> : vector<4x8xf32>
    %65 = vector.multi_reduction <add>, %64, %cst_12 [2] : vector<4x8x8xf32> to vector<4x8xf32>
    %66 = vector.shape_cast %65 : vector<4x8xf32> to vector<4x8x1xf32>
    %67 = tpu.reciprocal %66 {approx = true} : vector<4x8x1xf32> -> vector<4x8x1xf32>
    %68 = vector.broadcast %67 : vector<4x8x1xf32> to vector<4x8x8xf32>
    %69 = arith.mulf %64, %68 : vector<4x8x8xf32>
    %70 = arith.truncf %69 : vector<4x8x8xf32> to vector<4x8x8xbf16>
    "tpu.trace_start"() <{level = 10 : i32, message = "bqk,bkd->bqd"}> : () -> ()
    %cst_13 = arith.constant dense<0.000000e+00> : vector<4x8x8xf32>
    %71 = tpu.matmul %70, %50, %cst_13 {dimension_numbers = #tpu.dot_dimension_numbers<[2], [1], [1], [2], [0, 0, 0, 1, 1, 2], [0], [0]>} : vector<4x8x8xbf16>, vector<4x8x8xbf16>, vector<4x8x8xf32> -> vector<4x8x8xf32>
    "tpu.trace_stop"() : () -> ()
    %72 = arith.truncf %71 : vector<4x8x8xf32> to vector<4x8x8xbf16>
    %73 = vector.extract_strided_slice %72 {offsets = [0, 0, 0], sizes = [1, 8, 8], strides = [1, 1, 1]} : vector<4x8x8xbf16> to vector<1x8x8xbf16>
    %74 = vector.shape_cast %73 : vector<1x8x8xbf16> to vector<8x8xbf16>
    %c0_14 = arith.constant 0 : index
    %c0_15 = arith.constant 0 : index
    %c0_16 = arith.constant 0 : index
    %75 = vector.load %arg5[%c0_14, %c0_15, %c0_16] : memref<4x8x32xbf16, #tpu.memory_space<vmem>>, vector<1x8x32xbf16>
    %76 = vector.shape_cast %75 : vector<1x8x32xbf16> to vector<8x32xbf16>
    %cst_17 = arith.constant dense<0.000000e+00> : vector<8x32xf32>
    %77 = tpu.matmul %74, %76, %cst_17 {dimension_numbers = #tpu.dot_dimension_numbers<[1], [0], [0], [1], [0, 0, 1, 1], [], []>} : vector<8x8xbf16>, vector<8x32xbf16>, vector<8x32xf32> -> vector<8x32xf32>
    %78 = vector.extract_strided_slice %72 {offsets = [1, 0, 0], sizes = [1, 8, 8], strides = [1, 1, 1]} : vector<4x8x8xbf16> to vector<1x8x8xbf16>
    %79 = vector.shape_cast %78 : vector<1x8x8xbf16> to vector<8x8xbf16>
    %c1 = arith.constant 1 : index
    %c0_18 = arith.constant 0 : index
    %c0_19 = arith.constant 0 : index
    %80 = vector.load %arg5[%c1, %c0_18, %c0_19] : memref<4x8x32xbf16, #tpu.memory_space<vmem>>, vector<1x8x32xbf16>
    %81 = vector.shape_cast %80 : vector<1x8x32xbf16> to vector<8x32xbf16>
    %cst_20 = arith.constant dense<0.000000e+00> : vector<8x32xf32>
    %82 = tpu.matmul %79, %81, %cst_20 {dimension_numbers = #tpu.dot_dimension_numbers<[1], [0], [0], [1], [0, 0, 1, 1], [], []>} : vector<8x8xbf16>, vector<8x32xbf16>, vector<8x32xf32> -> vector<8x32xf32>
    %83 = arith.addf %77, %82 : vector<8x32xf32>
    %84 = vector.extract_strided_slice %72 {offsets = [2, 0, 0], sizes = [1, 8, 8], strides = [1, 1, 1]} : vector<4x8x8xbf16> to vector<1x8x8xbf16>
    %85 = vector.shape_cast %84 : vector<1x8x8xbf16> to vector<8x8xbf16>
    %c2 = arith.constant 2 : index
    %c0_21 = arith.constant 0 : index
    %c0_22 = arith.constant 0 : index
    %86 = vector.load %arg5[%c2, %c0_21, %c0_22] : memref<4x8x32xbf16, #tpu.memory_space<vmem>>, vector<1x8x32xbf16>
    %87 = vector.shape_cast %86 : vector<1x8x32xbf16> to vector<8x32xbf16>
    %cst_23 = arith.constant dense<0.000000e+00> : vector<8x32xf32>
    %88 = tpu.matmul %85, %87, %cst_23 {dimension_numbers = #tpu.dot_dimension_numbers<[1], [0], [0], [1], [0, 0, 1, 1], [], []>} : vector<8x8xbf16>, vector<8x32xbf16>, vector<8x32xf32> -> vector<8x32xf32>
    %89 = arith.addf %83, %88 : vector<8x32xf32>
    %90 = vector.extract_strided_slice %72 {offsets = [3, 0, 0], sizes = [1, 8, 8], strides = [1, 1, 1]} : vector<4x8x8xbf16> to vector<1x8x8xbf16>
    %91 = vector.shape_cast %90 : vector<1x8x8xbf16> to vector<8x8xbf16>
    %c3 = arith.constant 3 : index
    %c0_24 = arith.constant 0 : index
    %c0_25 = arith.constant 0 : index
    %92 = vector.load %arg5[%c3, %c0_24, %c0_25] : memref<4x8x32xbf16, #tpu.memory_space<vmem>>, vector<1x8x32xbf16>
    %93 = vector.shape_cast %92 : vector<1x8x32xbf16> to vector<8x32xbf16>
    %cst_26 = arith.constant dense<0.000000e+00> : vector<8x32xf32>
    %94 = tpu.matmul %91, %93, %cst_26 {dimension_numbers = #tpu.dot_dimension_numbers<[1], [0], [0], [1], [0, 0, 1, 1], [], []>} : vector<8x8xbf16>, vector<8x32xbf16>, vector<8x32xf32> -> vector<8x32xf32>
    %95 = arith.addf %89, %94 : vector<8x32xf32>
    %c0_27 = arith.constant 0 : index
    %c0_28 = arith.constant 0 : index
    %96 = vector.load %arg6[%c0_27, %c0_28] : memref<1x32xf32, #tpu.memory_space<vmem>>, vector<1x32xf32>
    %97 = vector.broadcast %96 : vector<1x32xf32> to vector<8x32xf32>
    %98 = arith.addf %95, %97 : vector<8x32xf32>
    %99 = arith.addf %1, %98 : vector<8x32xf32>
    %c0_29 = arith.constant 0 : index
    %c0_30 = arith.constant 0 : index
    %100 = vector.load %arg7[%c0_29, %c0_30] : memref<1x32xf32, #tpu.memory_space<vmem>>, vector<1x32xf32>
    %c0_31 = arith.constant 0 : index
    %c0_32 = arith.constant 0 : index
    %101 = vector.load %arg8[%c0_31, %c0_32] : memref<1x32xf32, #tpu.memory_space<vmem>>, vector<1x32xf32>
    %cst_33 = arith.constant dense<0.000000e+00> : vector<8xf32>
    %102 = vector.multi_reduction <add>, %99, %cst_33 [1] : vector<8x32xf32> to vector<8xf32>
    %103 = vector.shape_cast %102 : vector<8xf32> to vector<8x1xf32>
    %cst_34 = arith.constant 3.200000e+01 : f32
    %104 = vector.broadcast %cst_34 : f32 to vector<8x1xf32>
    %105 = arith.divf %103, %104 : vector<8x1xf32>
    %106 = vector.broadcast %105 : vector<8x1xf32> to vector<8x32xf32>
    %107 = arith.subf %99, %106 : vector<8x32xf32>
    %108 = arith.mulf %107, %107 : vector<8x32xf32>
    %cst_35 = arith.constant dense<0.000000e+00> : vector<8xf32>
    %109 = vector.multi_reduction <add>, %108, %cst_35 [1] : vector<8x32xf32> to vector<8xf32>
    %110 = vector.shape_cast %109 : vector<8xf32> to vector<8x1xf32>
    %cst_36 = arith.constant 3.200000e+01 : f32
    %111 = vector.broadcast %cst_36 : f32 to vector<8x1xf32>
    %112 = arith.divf %110, %111 : vector<8x1xf32>
    %cst_37 = arith.constant 9.99999974E-6 : f32
    %113 = vector.broadcast %cst_37 : f32 to vector<8x1xf32>
    %114 = arith.addf %112, %113 : vector<8x1xf32>
    %115 = math.rsqrt %114 : vector<8x1xf32>
    %116 = vector.broadcast %115 : vector<8x1xf32> to vector<8x32xf32>
    %117 = arith.mulf %107, %116 : vector<8x32xf32>
    %118 = vector.broadcast %100 : vector<1x32xf32> to vector<8x32xf32>
    %119 = arith.mulf %117, %118 : vector<8x32xf32>
    %120 = vector.broadcast %101 : vector<1x32xf32> to vector<8x32xf32>
    %121 = arith.addf %119, %120 : vector<8x32xf32>
    %122 = arith.truncf %121 : vector<8x32xf32> to vector<8x32xbf16>
    %c0_38 = arith.constant 0 : index
    %c0_39 = arith.constant 0 : index
    %123 = vector.load %arg9[%c0_38, %c0_39] : memref<32x64xbf16, #tpu.memory_space<vmem>>, vector<32x64xbf16>
    %cst_40 = arith.constant dense<0.000000e+00> : vector<8x64xf32>
    %124 = tpu.matmul %122, %123, %cst_40 {dimension_numbers = #tpu.dot_dimension_numbers<[1], [0], [0], [1], [0, 0, 1, 1], [], []>} : vector<8x32xbf16>, vector<32x64xbf16>, vector<8x64xf32> -> vector<8x64xf32>
    %c0_41 = arith.constant 0 : index
    %c0_42 = arith.constant 0 : index
    %125 = vector.load %arg10[%c0_41, %c0_42] : memref<1x64xf32, #tpu.memory_space<vmem>>, vector<1x64xf32>
    %126 = vector.broadcast %125 : vector<1x64xf32> to vector<8x64xf32>
    %127 = arith.addf %124, %126 : vector<8x64xf32>
    %cst_43 = arith.constant 0.000000e+00 : f32
    %128 = vector.broadcast %cst_43 : f32 to vector<8x64xf32>
    %129 = arith.maximumf %127, %128 : vector<8x64xf32>
    %130 = arith.truncf %129 : vector<8x64xf32> to vector<8x64xbf16>
    %c0_44 = arith.constant 0 : index
    %c0_45 = arith.constant 0 : index
    %131 = vector.load %arg11[%c0_44, %c0_45] : memref<64x32xbf16, #tpu.memory_space<vmem>>, vector<64x32xbf16>
    %cst_46 = arith.constant dense<0.000000e+00> : vector<8x32xf32>
    %132 = tpu.matmul %130, %131, %cst_46 {dimension_numbers = #tpu.dot_dimension_numbers<[1], [0], [0], [1], [0, 0, 1, 1], [], []>} : vector<8x64xbf16>, vector<64x32xbf16>, vector<8x32xf32> -> vector<8x32xf32>
    %c0_47 = arith.constant 0 : index
    %c0_48 = arith.constant 0 : index
    %133 = vector.load %arg12[%c0_47, %c0_48] : memref<1x32xf32, #tpu.memory_space<vmem>>, vector<1x32xf32>
    %134 = vector.broadcast %133 : vector<1x32xf32> to vector<8x32xf32>
    %135 = arith.addf %132, %134 : vector<8x32xf32>
    %136 = arith.addf %121, %135 : vector<8x32xf32>
    %c0_49 = arith.constant 0 : index
    %c0_50 = arith.constant 0 : index
    %137 = vector.load %arg13[%c0_49, %c0_50] : memref<1x32xf32, #tpu.memory_space<vmem>>, vector<1x32xf32>
    %c0_51 = arith.constant 0 : index
    %c0_52 = arith.constant 0 : index
    %138 = vector.load %arg14[%c0_51, %c0_52] : memref<1x32xf32, #tpu.memory_space<vmem>>, vector<1x32xf32>
    %cst_53 = arith.constant dense<0.000000e+00> : vector<8xf32>
    %139 = vector.multi_reduction <add>, %136, %cst_53 [1] : vector<8x32xf32> to vector<8xf32>
    %140 = vector.shape_cast %139 : vector<8xf32> to vector<8x1xf32>
    %cst_54 = arith.constant 3.200000e+01 : f32
    %141 = vector.broadcast %cst_54 : f32 to vector<8x1xf32>
    %142 = arith.divf %140, %141 : vector<8x1xf32>
    %143 = vector.broadcast %142 : vector<8x1xf32> to vector<8x32xf32>
    %144 = arith.subf %136, %143 : vector<8x32xf32>
    %145 = arith.mulf %144, %144 : vector<8x32xf32>
    %cst_55 = arith.constant dense<0.000000e+00> : vector<8xf32>
    %146 = vector.multi_reduction <add>, %145, %cst_55 [1] : vector<8x32xf32> to vector<8xf32>
    %147 = vector.shape_cast %146 : vector<8xf32> to vector<8x1xf32>
    %cst_56 = arith.constant 3.200000e+01 : f32
    %148 = vector.broadcast %cst_56 : f32 to vector<8x1xf32>
    %149 = arith.divf %147, %148 : vector<8x1xf32>
    %cst_57 = arith.constant 9.99999974E-6 : f32
    %150 = vector.broadcast %cst_57 : f32 to vector<8x1xf32>
    %151 = arith.addf %149, %150 : vector<8x1xf32>
    %152 = math.rsqrt %151 : vector<8x1xf32>
    %153 = vector.broadcast %152 : vector<8x1xf32> to vector<8x32xf32>
    %154 = arith.mulf %144, %153 : vector<8x32xf32>
    %155 = vector.broadcast %137 : vector<1x32xf32> to vector<8x32xf32>
    %156 = arith.mulf %154, %155 : vector<8x32xf32>
    %157 = vector.broadcast %138 : vector<1x32xf32> to vector<8x32xf32>
    %158 = arith.addf %156, %157 : vector<8x32xf32>
    %159 = vector.shape_cast %158 : vector<8x32xf32> to vector<1x8x32xf32>
    %c0_58 = arith.constant 0 : index
    %c0_59 = arith.constant 0 : index
    %c0_60 = arith.constant 0 : index
    %160 = vector.load %arg15[%c0_58, %c0_59, %c0_60] : memref<1x8x32xf32, #tpu.memory_space<vmem>>, vector<1x8x32xf32>
    tpu.vector_store %arg15[%c0_58, %c0_59, %c0_60], %159 {strides = array<i32>} : memref<1x8x32xf32, #tpu.memory_space<vmem>>, vector<1x8x32xf32>,
    return
  }
  func.func @transform_0(%arg0: i32) -> (i32, i32, i32) {
    %c0_i32 = arith.constant 0 : i32
    %c0_i32_0 = arith.constant 0 : i32
    %c0_i32_1 = arith.constant 0 : i32
    return %arg0, %c0_i32, %c0_i32_0 : i32, i32, i32
  }
  func.func @transform_1(%arg0: i32) -> (i32, i32, i32) {
    %c0_i32 = arith.constant 0 : i32
    %c0_i32_0 = arith.constant 0 : i32
    %c0_i32_1 = arith.constant 0 : i32
    return %arg0, %c0_i32, %c0_i32_0 : i32, i32, i32
  }
  func.func @transform_2(%arg0: i32) -> (i32, i32) {
    %c0_i32 = arith.constant 0 : i32
    %c0_i32_0 = arith.constant 0 : i32
    %c0_i32_1 = arith.constant 0 : i32
    return %c0_i32, %c0_i32_0 : i32, i32
  }
  func.func @transform_3(%arg0: i32) -> (i32, i32) {
    %c0_i32 = arith.constant 0 : i32
    %c0_i32_0 = arith.constant 0 : i32
    %c0_i32_1 = arith.constant 0 : i32
    return %c0_i32, %c0_i32_0 : i32, i32
  }
  func.func @transform_4(%arg0: i32) -> (i32, i32, i32) {
    %c0_i32 = arith.constant 0 : i32
    %c0_i32_0 = arith.constant 0 : i32
    %c0_i32_1 = arith.constant 0 : i32
    %c0_i32_2 = arith.constant 0 : i32
    return %c0_i32, %c0_i32_0, %c0_i32_1 : i32, i32, i32
  }
  func.func @transform_5(%arg0: i32) -> (i32, i32) {
    %c0_i32 = arith.constant 0 : i32
    %c0_i32_0 = arith.constant 0 : i32
    %c0_i32_1 = arith.constant 0 : i32
    return %c0_i32, %c0_i32_0 : i32, i32
  }
  func.func @transform_6(%arg0: i32) -> (i32, i32) {
    %c0_i32 = arith.constant 0 : i32
    %c0_i32_0 = arith.constant 0 : i32
    %c0_i32_1 = arith.constant 0 : i32
    return %c0_i32, %c0_i32_0 : i32, i32
  }
  func.func @transform_7(%arg0: i32) -> (i32, i32) {
    %c0_i32 = arith.constant 0 : i32
    %c0_i32_0 = arith.constant 0 : i32
    %c0_i32_1 = arith.constant 0 : i32
    return %c0_i32, %c0_i32_0 : i32, i32
  }
  func.func @transform_8(%arg0: i32) -> (i32, i32) {
    %c0_i32 = arith.constant 0 : i32
    %c0_i32_0 = arith.constant 0 : i32
    %c0_i32_1 = arith.constant 0 : i32
    return %c0_i32, %c0_i32_0 : i32, i32
  }
  func.func @transform_9(%arg0: i32) -> (i32, i32) {
    %c0_i32 = arith.constant 0 : i32
    %c0_i32_0 = arith.constant 0 : i32
    %c0_i32_1 = arith.constant 0 : i32
    return %c0_i32, %c0_i32_0 : i32, i32
  }
  func.func @transform_10(%arg0: i32) -> (i32, i32) {
    %c0_i32 = arith.constant 0 : i32
    %c0_i32_0 = arith.constant 0 : i32
    %c0_i32_1 = arith.constant 0 : i32
    return %c0_i32, %c0_i32_0 : i32, i32
  }
  func.func @transform_11(%arg0: i32) -> (i32, i32) {
    %c0_i32 = arith.constant 0 : i32
    %c0_i32_0 = arith.constant 0 : i32
    %c0_i32_1 = arith.constant 0 : i32
    return %c0_i32, %c0_i32_0 : i32, i32
  }
  func.func @transform_12(%arg0: i32) -> (i32, i32) {
    %c0_i32 = arith.constant 0 : i32
    %c0_i32_0 = arith.constant 0 : i32
    %c0_i32_1 = arith.constant 0 : i32
    return %c0_i32, %c0_i32_0 : i32, i32
  }
  func.func @transform_13(%arg0: i32) -> (i32, i32) {
    %c0_i32 = arith.constant 0 : i32
    %c0_i32_0 = arith.constant 0 : i32
    %c0_i32_1 = arith.constant 0 : i32
    return %c0_i32, %c0_i32_0 : i32, i32
  }
  func.func @transform_14(%arg0: i32) -> (i32, i32, i32) {
    %c0_i32 = arith.constant 0 : i32
    %c0_i32_0 = arith.constant 0 : i32
    %c0_i32_1 = arith.constant 0 : i32
    return %arg0, %c0_i32, %c0_i32_0 : i32, i32, i32
  }
}

module attributes {stable_mosaic.version = 11 : i64} {
  func.func @encoder_layer_kernel(%arg0: i32, %arg1: memref<1x8x32xf32, #tpu.memory_space<vmem>>, %arg2: memref<1x1x8xf32, #tpu.memory_space<vmem>>, %arg3: memref<32x96xbf16, #tpu.memory_space<vmem>>, %arg4: memref<1x96xf32, #tpu.memory_space<vmem>>, %arg5: memref<4x8x32xbf16, #tpu.memory_space<vmem>>, %arg6: memref<1x32xf32, #tpu.memory_space<vmem>>, %arg7: memref<1x32xf32, #tpu.memory_space<vmem>>, %arg8: memref<1x32xf32, #tpu.memory_space<vmem>>, %arg9: memref<32x64xbf16, #tpu.memory_space<vmem>>, %arg10: memref<1x64xf32, #tpu.memory_space<vmem>>, %arg11: memref<64x32xbf16, #tpu.memory_space<vmem>>, %arg12: memref<1x32xf32, #tpu.memory_space<vmem>>, %arg13: memref<1x32xf32, #tpu.memory_space<vmem>>, %arg14: memref<1x32xf32, #tpu.memory_space<vmem>>, %arg15: memref<1x8x32xf32, #tpu.memory_space<vmem>>) attributes {dimension_semantics = [#tpu.dimension_semantics<parallel>], iteration_bounds = array<i64: 2>, scalar_prefetch = 0 : i64, scratch_operands = 0 : i64, tpu.core_type = #tpu.core_type<tc>, window_params = [{transform_indices = @transform_0, window_bounds = array<i64: 1, 8, 32>}, {transform_indices = @transform_1, window_bounds = array<i64: 1, 1, 8>}, {pipeline_mode = #tpu.pipeline_mode<synchronous>, transform_indices = @transform_2, window_bounds = array<i64: 32, 96>}, {pipeline_mode = #tpu.pipeline_mode<synchronous>, transform_indices = @transform_3, window_bounds = array<i64: 1, 96>}, {pipeline_mode = #tpu.pipeline_mode<synchronous>, transform_indices = @transform_4, window_bounds = array<i64: 4, 8, 32>}, {pipeline_mode = #tpu.pipeline_mode<synchronous>, transform_indices = @transform_5, window_bounds = array<i64: 1, 32>}, {pipeline_mode = #tpu.pipeline_mode<synchronous>, transform_indices = @transform_6, window_bounds = array<i64: 1, 32>}, {pipeline_mode = #tpu.pipeline_mode<synchronous>, transform_indices = @transform_7, window_bounds = array<i64: 1, 32>}, {pipeline_mode = #tpu.pipeline_mode<synchronous>, transform_indices = @transform_8, window_bounds = array<i64: 32, 64>}, {pipeline_mode = #tpu.pipeline_mode<synchronous>, transform_indices = @transform_9, window_bounds = array<i64: 1, 64>}, {pipeline_mode = #tpu.pipeline_mode<synchronous>, transform_indices = @transform_10, window_bounds = array<i64: 64, 32>}, {pipeline_mode = #tpu.pipeline_mode<synchronous>, transform_indices = @transform_11, window_bounds = array<i64: 1, 32>}, {pipeline_mode = #tpu.pipeline_mode<synchronous>, transform_indices = @transform_12, window_bounds = array<i64: 1, 32>}, {pipeline_mode = #tpu.pipeline_mode<synchronous>, transform_indices = @transform_13, window_bounds = array<i64: 1, 32>}, {transform_indices = @transform_14, window_bounds = array<i64: 1, 8, 32>}]} {
    %c0 = arith.constant 0 : index
    %c0_0 = arith.constant 0 : index
    %c0_1 = arith.constant 0 : index
    %0 = vector.load %arg1[%c0, %c0_0, %c0_1] : memref<1x8x32xf32, #tpu.memory_space<vmem>>, vector<1x8x32xf32>
    %1 = vector.shape_cast %0 : vector<1x8x32xf32> to vector<8x32xf32>
    %2 = arith.truncf %1 : vector<8x32xf32> to vector<8x32xbf16>
    %c0_2 = arith.constant 0 : index
    %c0_3 = arith.constant 0 : index
    %3 = vector.load %arg3[%c0_2, %c0_3] : memref<32x96xbf16, #tpu.memory_space<vmem>>, vector<32x96xbf16>
    %cst = arith.constant dense<0.000000e+00> : vector<8x96xf32>
    %4 = tpu.matmul %2, %3, %cst {dimension_numbers = #tpu.dot_dimension_numbers<[1], [0], [0], [1], [0, 0, 1, 1], [], []>} : vector<8x32xbf16>, vector<32x96xbf16>, vector<8x96xf32> -> vector<8x96xf32>
    %c0_4 = arith.constant 0 : index
    %c0_5 = arith.constant 0 : index
    %5 = vector.load %arg4[%c0_4, %c0_5] : memref<1x96xf32, #tpu.memory_space<vmem>>, vector<1x96xf32>
    %6 = vector.broadcast %5 : vector<1x96xf32> to vector<8x96xf32>
    %7 = arith.addf %4, %6 : vector<8x96xf32>
    %8 = arith.truncf %7 : vector<8x96xf32> to vector<8x96xbf16>
    %9 = vector.extract_strided_slice %8 {offsets = [0, 0], sizes = [8, 8], strides = [1, 1]} : vector<8x96xbf16> to vector<8x8xbf16>
    %10 = vector.shape_cast %9 : vector<8x8xbf16> to vector<1x8x8xbf16>
    %11 = vector.extract_strided_slice %8 {offsets = [0, 8], sizes = [8, 8], strides = [1, 1]} : vector<8x96xbf16> to vector<8x8xbf16>
    %12 = vector.shape_cast %11 : vector<8x8xbf16> to vector<1x8x8xbf16>
    %13 = vector.extract_strided_slice %8 {offsets = [0, 16], sizes = [8, 8], strides = [1, 1]} : vector<8x96xbf16> to vector<8x8xbf16>
    %14 = vector.shape_cast %13 : vector<8x8xbf16> to vector<1x8x8xbf16>
    %15 = vector.extract_strided_slice %8 {offsets = [0, 24], sizes = [8, 8], strides = [1, 1]} : vector<8x96xbf16> to vector<8x8xbf16>
    %16 = vector.shape_cast %15 : vector<8x8xbf16> to vector<1x8x8xbf16>
    %17 = vector.shape_cast %10 : vector<1x8x8xbf16> to vector<1x1x8x8xbf16>
    %18 = vector.shape_cast %12 : vector<1x8x8xbf16> to vector<1x1x8x8xbf16>
    %19 = vector.shape_cast %14 : vector<1x8x8xbf16> to vector<1x1x8x8xbf16>
    %20 = vector.shape_cast %16 : vector<1x8x8xbf16> to vector<1x1x8x8xbf16>
    %21 = tpu.concatenate %17, %18, %19, %20 in 0 : vector<1x1x8x8xbf16>, vector<1x1x8x8xbf16>, vector<1x1x8x8xbf16>, vector<1x1x8x8xbf16> -> vector<4x1x8x8xbf16>
    %22 = vector.shape_cast %21 : vector<4x1x8x8xbf16> to vector<4x8x8xbf16>
    %23 = vector.extract_strided_slice %8 {offsets = [0, 32], sizes = [8, 8], strides = [1, 1]} : vector<8x96xbf16> to vector<8x8xbf16>
    %24 = vector.shape_cast %23 : vector<8x8xbf16> to vector<1x8x8xbf16>
    %25 = vector.extract_strided_slice %8 {offsets = [0, 40], sizes = [8, 8], strides = [1, 1]} : vector<8x96xbf16> to vector<8x8xbf16>
    %26 = vector.shape_cast %25 : vector<8x8xbf16> to vector<1x8x8xbf16>
    %27 = vector.extract_strided_slice %8 {offsets = [0, 48], sizes = [8, 8], strides = [1, 1]} : vector<8x96xbf16> to vector<8x8xbf16>
    %28 = vector.shape_cast %27 : vector<8x8xbf16> to vector<1x8x8xbf16>
    %29 = vector.extract_strided_slice %8 {offsets = [0, 56], sizes = [8, 8], strides = [1, 1]} : vector<8x96xbf16> to vector<8x8xbf16>
    %30 = vector.shape_cast %29 : vector<8x8xbf16> to vector<1x8x8xbf16>
    %31 = vector.shape_cast %24 : vector<1x8x8xbf16> to vector<1x1x8x8xbf16>
    %32 = vector.shape_cast %26 : vector<1x8x8xbf16> to vector<1x1x8x8xbf16>
    %33 = vector.shape_cast %28 : vector<1x8x8xbf16> to vector<1x1x8x8xbf16>
    %34 = vector.shape_cast %30 : vector<1x8x8xbf16> to vector<1x1x8x8xbf16>
    %35 = tpu.concatenate %31, %32, %33, %34 in 0 : vector<1x1x8x8xbf16>, vector<1x1x8x8xbf16>, vector<1x1x8x8xbf16>, vector<1x1x8x8xbf16> -> vector<4x1x8x8xbf16>
    %36 = vector.shape_cast %35 : vector<4x1x8x8xbf16> to vector<4x8x8xbf16>
    %37 = vector.extract_strided_slice %8 {offsets = [0, 64], sizes = [8, 8], strides = [1, 1]} : vector<8x96xbf16> to vector<8x8xbf16>
    %38 = vector.shape_cast %37 : vector<8x8xbf16> to vector<1x8x8xbf16>
    %39 = vector.extract_strided_slice %8 {offsets = [0, 72], sizes = [8, 8], strides = [1, 1]} : vector<8x96xbf16> to vector<8x8xbf16>
    %40 = vector.shape_cast %39 : vector<8x8xbf16> to vector<1x8x8xbf16>
    %41 = vector.extract_strided_slice %8 {offsets = [0, 80], sizes = [8, 8], strides = [1, 1]} : vector<8x96xbf16> to vector<8x8xbf16>
    %42 = vector.shape_cast %41 : vector<8x8xbf16> to vector<1x8x8xbf16>
    %43 = vector.extract_strided_slice %8 {offsets = [0, 88], sizes = [8, 8], strides = [1, 1]} : vector<8x96xbf16> to vector<8x8xbf16>
    %44 = vector.shape_cast %43 : vector<8x8xbf16> to vector<1x8x8xbf16>
    %45 = vector.shape_cast %38 : vector<1x8x8xbf16> to vector<1x1x8x8xbf16>
    %46 = vector.shape_cast %40 : vector<1x8x8xbf16> to vector<1x1x8x8xbf16>
    %47 = vector.shape_cast %42 : vector<1x8x8xbf16> to vector<1x1x8x8xbf16>
    %48 = vector.shape_cast %44 : vector<1x8x8xbf16> to vector<1x1x8x8xbf16>
    %49 = tpu.concatenate %45, %46, %47, %48 in 0 : vector<1x1x8x8xbf16>, vector<1x1x8x8xbf16>, vector<1x1x8x8xbf16>, vector<1x1x8x8xbf16> -> vector<4x1x8x8xbf16>
    %50 = vector.shape_cast %49 : vector<4x1x8x8xbf16> to vector<4x8x8xbf16>
    %c0_6 = arith.constant 0 : index
    %c0_7 = arith.constant 0 : index
    %c0_8 = arith.constant 0 : index
    %51 = vector.load %arg2[%c0_6, %c0_7, %c0_8] : memref<1x1x8xf32, #tpu.memory_space<vmem>>, vector<1x1x8xf32>
    "tpu.trace_start"() <{level = 10 : i32, message = "bqd,bkd->bqk"}> : () -> ()
    %cst_9 = arith.constant dense<0.000000e+00> : vector<4x8x8xf32>
    %52 = tpu.matmul %22, %36, %cst_9 {dimension_numbers = #tpu.dot_dimension_numbers<[2], [2], [1], [1], [0, 0, 0, 1, 1, 1], [0], [0]>} : vector<4x8x8xbf16>, vector<4x8x8xbf16>, vector<4x8x8xf32> -> vector<4x8x8xf32>
    "tpu.trace_stop"() : () -> ()
    %cst_10 = arith.constant 0.353553385 : f32
    %53 = vector.broadcast %cst_10 : f32 to vector<4x8x8xf32>
    %54 = arith.mulf %52, %53 : vector<4x8x8xf32>
    %55 = vector.shape_cast %54 : vector<4x8x8xf32> to vector<4x1x8x8xf32>
    %56 = vector.shape_cast %51 : vector<1x1x8xf32> to vector<1x1x1x8xf32>
    %57 = vector.broadcast %56 : vector<1x1x1x8xf32> to vector<4x1x8x8xf32>
    %58 = arith.addf %55, %57 : vector<4x1x8x8xf32>
    %59 = vector.shape_cast %58 : vector<4x1x8x8xf32> to vector<4x8x8xf32>
    %cst_11 = arith.constant dense<0xFF800000> : vector<4x8xf32>
    %60 = vector.multi_reduction <maximumf>, %59, %cst_11 [2] : vector<4x8x8xf32> to vector<4x8xf32>
    %61 = vector.shape_cast %60 : vector<4x8xf32> to vector<4x8x1xf32>
    %62 = vector.broadcast %61 : vector<4x8x1xf32> to vector<4x8x8xf32>
    %63 = arith.subf %59, %62 : vector<4x8x8xf32>
    %64 = math.exp %63 : vector<4x8x8xf32>
    %cst_12 = arith.constant dense<0.000000e+00> : vector<4x8xf32>
    %65 = vector.multi_reduction <add>, %64, %cst_12 [2] : vector<4x8x8xf32> to vector<4x8xf32>
    %66 = vector.shape_cast %65 : vector<4x8xf32> to vector<4x8x1xf32>
    %67 = tpu.reciprocal %66 {approx = true} : vector<4x8x1xf32> -> vector<4x8x1xf32>
    %68 = vector.broadcast %67 : vector<4x8x1xf32> to vector<4x8x8xf32>
    %69 = arith.mulf %64, %68 : vector<4x8x8xf32>
    %70 = arith.truncf %69 : vector<4x8x8xf32> to vector<4x8x8xbf16>
    "tpu.trace_start"() <{level = 10 : i32, message = "bqk,bkd->bqd"}> : () -> ()
    %cst_13 = arith.constant dense<0.000000e+00> : vector<4x8x8xf32>
    %71 = tpu.matmul %70, %50, %cst_13 {dimension_numbers = #tpu.dot_dimension_numbers<[2], [1], [1], [2], [0, 0, 0, 1, 1, 2], [0], [0]>} : vector<4x8x8xbf16>, vector<4x8x8xbf16>, vector<4x8x8xf32> -> vector<4x8x8xf32>
    "tpu.trace_stop"() : () -> ()
    %72 = arith.truncf %71 : vector<4x8x8xf32> to vector<4x8x8xbf16>
    %73 = vector.extract_strided_slice %72 {offsets = [0, 0, 0], sizes = [1, 8, 8], strides = [1, 1, 1]} : vector<4x8x8xbf16> to vector<1x8x8xbf16>
    %74 = vector.shape_cast %73 : vector<1x8x8xbf16> to vector<8x8xbf16>
    %c0_14 = arith.constant 0 : index
    %c0_15 = arith.constant 0 : index
    %c0_16 = arith.constant 0 : index
    %75 = vector.load %arg5[%c0_14, %c0_15, %c0_16] : memref<4x8x32xbf16, #tpu.memory_space<vmem>>, vector<1x8x32xbf16>
    %76 = vector.shape_cast %75 : vector<1x8x32xbf16> to vector<8x32xbf16>
    %cst_17 = arith.constant dense<0.000000e+00> : vector<8x32xf32>
    %77 = tpu.matmul %74, %76, %cst_17 {dimension_numbers = #tpu.dot_dimension_numbers<[1], [0], [0], [1], [0, 0, 1, 1], [], []>} : vector<8x8xbf16>, vector<8x32xbf16>, vector<8x32xf32> -> vector<8x32xf32>
    %78 = vector.extract_strided_slice %72 {offsets = [1, 0, 0], sizes = [1, 8, 8], strides = [1, 1, 1]} : vector<4x8x8xbf16> to vector<1x8x8xbf16>
    %79 = vector.shape_cast %78 : vector<1x8x8xbf16> to vector<8x8xbf16>
    %c1 = arith.constant 1 : index
    %c0_18 = arith.constant 0 : index
    %c0_19 = arith.constant 0 : index
    %80 = vector.load %arg5[%c1, %c0_18, %c0_19] : memref<4x8x32xbf16, #tpu.memory_space<vmem>>, vector<1x8x32xbf16>
    %81 = vector.shape_cast %80 : vector<1x8x32xbf16> to vector<8x32xbf16>
    %cst_20 = arith.constant dense<0.000000e+00> : vector<8x32xf32>
    %82 = tpu.matmul %79, %81, %cst_20 {dimension_numbers = #tpu.dot_dimension_numbers<[1], [0], [0], [1], [0, 0, 1, 1], [], []>} : vector<8x8xbf16>, vector<8x32xbf16>, vector<8x32xf32> -> vector<8x32xf32>
    %83 = arith.addf %77, %82 : vector<8x32xf32>
    %84 = vector.extract_strided_slice %72 {offsets = [2, 0, 0], sizes = [1, 8, 8], strides = [1, 1, 1]} : vector<4x8x8xbf16> to vector<1x8x8xbf16>
    %85 = vector.shape_cast %84 : vector<1x8x8xbf16> to vector<8x8xbf16>
    %c2 = arith.constant 2 : index
    %c0_21 = arith.constant 0 : index
    %c0_22 = arith.constant 0 : index
    %86 = vector.load %arg5[%c2, %c0_21, %c0_22] : memref<4x8x32xbf16, #tpu.memory_space<vmem>>, vector<1x8x32xbf16>
    %87 = vector.shape_cast %86 : vector<1x8x32xbf16> to vector<8x32xbf16>
    %cst_23 = arith.constant dense<0.000000e+00> : vector<8x32xf32>
    %88 = tpu.matmul %85, %87, %cst_23 {dimension_numbers = #tpu.dot_dimension_numbers<[1], [0], [0], [1], [0, 0, 1, 1], [], []>} : vector<8x8xbf16>, vector<8x32xbf16>, vector<8x32xf32> -> vector<8x32xf32>
    %89 = arith.addf %83, %88 : vector<8x32xf32>
    %90 = vector.extract_strided_slice %72 {offsets = [3, 0, 0], sizes = [1, 8, 8], strides = [1, 1, 1]} : vector<4x8x8xbf16> to vector<1x8x8xbf16>
    %91 = vector.shape_cast %90 : vector<1x8x8xbf16> to vector<8x8xbf16>
    %c3 = arith.constant 3 : index
    %c0_24 = arith.constant 0 : index
    %c0_25 = arith.constant 0 : index
    %92 = vector.load %arg5[%c3, %c0_24, %c0_25] : memref<4x8x32xbf16, #tpu.memory_space<vmem>>, vector<1x8x32xbf16>
    %93 = vector.shape_cast %92 : vector<1x8x32xbf16> to vector<8x32xbf16>
    %cst_26 = arith.constant dense<0.000000e+00> : vector<8x32xf32>
    %94 = tpu.matmul %91, %93, %cst_26 {dimension_numbers = #tpu.dot_dimension_numbers<[1], [0], [0], [1], [0, 0, 1, 1], [], []>} : vector<8x8xbf16>, vector<8x32xbf16>, vector<8x32xf32> -> vector<8x32xf32>
    %95 = arith.addf %89, %94 : vector<8x32xf32>
    %c0_27 = arith.constant 0 : index
    %c0_28 = arith.constant 0 : index
    %96 = vector.load %arg6[%c0_27, %c0_28] : memref<1x32xf32, #tpu.memory_space<vmem>>, vector<1x32xf32>
    %97 = vector.broadcast %96 : vector<1x32xf32> to vector<8x32xf32>
    %98 = arith.addf %95, %97 : vector<8x32xf32>
    %99 = arith.addf %1, %98 : vector<8x32xf32>
    %c0_29 = arith.constant 0 : index
    %c0_30 = arith.constant 0 : index
    %100 = vector.load %arg7[%c0_29, %c0_30] : memref<1x32xf32, #tpu.memory_space<vmem>>, vector<1x32xf32>
    %c0_31 = arith.constant 0 : index
    %c0_32 = arith.constant 0 : index
    %101 = vector.load %arg8[%c0_31, %c0_32] : memref<1x32xf32, #tpu.memory_space<vmem>>, vector<1x32xf32>
    %cst_33 = arith.constant dense<0.000000e+00> : vector<8xf32>
    %102 = vector.multi_reduction <add>, %99, %cst_33 [1] : vector<8x32xf32> to vector<8xf32>
    %103 = vector.shape_cast %102 : vector<8xf32> to vector<8x1xf32>
    %cst_34 = arith.constant 3.200000e+01 : f32
    %104 = vector.broadcast %cst_34 : f32 to vector<8x1xf32>
    %105 = arith.divf %103, %104 : vector<8x1xf32>
    %106 = vector.broadcast %105 : vector<8x1xf32> to vector<8x32xf32>
    %107 = arith.subf %99, %106 : vector<8x32xf32>
    %108 = arith.mulf %107, %107 : vector<8x32xf32>
    %cst_35 = arith.constant dense<0.000000e+00> : vector<8xf32>
    %109 = vector.multi_reduction <add>, %108, %cst_35 [1] : vector<8x32xf32> to vector<8xf32>
    %110 = vector.shape_cast %109 : vector<8xf32> to vector<8x1xf32>
    %cst_36 = arith.constant 3.200000e+01 : f32
    %111 = vector.broadcast %cst_36 : f32 to vector<8x1xf32>
    %112 = arith.divf %110, %111 : vector<8x1xf32>
    %cst_37 = arith.constant 9.99999974E-6 : f32
    %113 = vector.broadcast %cst_37 : f32 to vector<8x1xf32>
    %114 = arith.addf %112, %113 : vector<8x1xf32>
    %115 = math.rsqrt %114 : vector<8x1xf32>
    %116 = vector.broadcast %115 : vector<8x1xf32> to vector<8x32xf32>
    %117 = arith.mulf %107, %116 : vector<8x32xf32>
    %118 = vector.broadcast %100 : vector<1x32xf32> to vector<8x32xf32>
    %119 = arith.mulf %117, %118 : vector<8x32xf32>
    %120 = vector.broadcast %101 : vector<1x32xf32> to vector<8x32xf32>
    %121 = arith.addf %119, %120 : vector<8x32xf32>
    %122 = arith.truncf %121 : vector<8x32xf32> to vector<8x32xbf16>
    %c0_38 = arith.constant 0 : index
    %c0_39 = arith.constant 0 : index
    %123 = vector.load %arg9[%c0_38, %c0_39] : memref<32x64xbf16, #tpu.memory_space<vmem>>, vector<32x64xbf16>
    %cst_40 = arith.constant dense<0.000000e+00> : vector<8x64xf32>
    %124 = tpu.matmul %122, %123, %cst_40 {dimension_numbers = #tpu.dot_dimension_numbers<[1], [0], [0], [1], [0, 0, 1, 1], [], []>} : vector<8x32xbf16>, vector<32x64xbf16>, vector<8x64xf32> -> vector<8x64xf32>
    %c0_41 = arith.constant 0 : index
    %c0_42 = arith.constant 0 : index
    %125 = vector.load %arg10[%c0_41, %c0_42] : memref<1x64xf32, #tpu.memory_space<vmem>>, vector<1x64xf32>
    %126 = vector.broadcast %125 : vector<1x64xf32> to vector<8x64xf32>
    %127 = arith.addf %124, %126 : vector<8x64xf32>
    %cst_43 = arith.constant 0.000000e+00 : f32
    %128 = vector.broadcast %cst_43 : f32 to vector<8x64xf32>
    %129 = arith.maximumf %127, %128 : vector<8x64xf32>
    %130 = arith.truncf %129 : vector<8x64xf32> to vector<8x64xbf16>
    %c0_44 = arith.constant 0 : index
    %c0_45 = arith.constant 0 : index
    %131 = vector.load %arg11[%c0_44, %c0_45] : memref<64x32xbf16, #tpu.memory_space<vmem>>, vector<64x32xbf16>
    %cst_46 = arith.constant dense<0.000000e+00> : vector<8x32xf32>
    %132 = tpu.matmul %130, %131, %cst_46 {dimension_numbers = #tpu.dot_dimension_numbers<[1], [0], [0], [1], [0, 0, 1, 1], [], []>} : vector<8x64xbf16>, vector<64x32xbf16>, vector<8x32xf32> -> vector<8x32xf32>
    %c0_47 = arith.constant 0 : index
    %c0_48 = arith.constant 0 : index
    %133 = vector.load %arg12[%c0_47, %c0_48] : memref<1x32xf32, #tpu.memory_space<vmem>>, vector<1x32xf32>
    %134 = vector.broadcast %133 : vector<1x32xf32> to vector<8x32xf32>
    %135 = arith.addf %132, %134 : vector<8x32xf32>
    %136 = arith.addf %121, %135 : vector<8x32xf32>
    %c0_49 = arith.constant 0 : index
    %c0_50 = arith.constant 0 : index
    %137 = vector.load %arg13[%c0_49, %c0_50] : memref<1x32xf32, #tpu.memory_space<vmem>>, vector<1x32xf32>
    %c0_51 = arith.constant 0 : index
    %c0_52 = arith.constant 0 : index
    %138 = vector.load %arg14[%c0_51, %c0_52] : memref<1x32xf32, #tpu.memory_space<vmem>>, vector<1x32xf32>
    %cst_53 = arith.constant dense<0.000000e+00> : vector<8xf32>
    %139 = vector.multi_reduction <add>, %136, %cst_53 [1] : vector<8x32xf32> to vector<8xf32>
    %140 = vector.shape_cast %139 : vector<8xf32> to vector<8x1xf32>
    %cst_54 = arith.constant 3.200000e+01 : f32
    %141 = vector.broadcast %cst_54 : f32 to vector<8x1xf32>
    %142 = arith.divf %140, %141 : vector<8x1xf32>
    %143 = vector.broadcast %142 : vector<8x1xf32> to vector<8x32xf32>
    %144 = arith.subf %136, %143 : vector<8x32xf32>
    %145 = arith.mulf %144, %144 : vector<8x32xf32>
    %cst_55 = arith.constant dense<0.000000e+00> : vector<8xf32>
    %146 = vector.multi_reduction <add>, %145, %cst_55 [1] : vector<8x32xf32> to vector<8xf32>
    %147 = vector.shape_cast %146 : vector<8xf32> to vector<8x1xf32>
    %cst_56 = arith.constant 3.200000e+01 : f32
    %148 = vector.broadcast %cst_56 : f32 to vector<8x1xf32>
    %149 = arith.divf %147, %148 : vector<8x1xf32>
    %cst_57 = arith.constant 9.99999974E-6 : f32
    %150 = vector.broadcast %cst_57 : f32 to vector<8x1xf32>
    %151 = arith.addf %149, %150 : vector<8x1xf32>
    %152 = math.rsqrt %151 : vector<8x1xf32>
    %153 = vector.broadcast %152 : vector<8x1xf32> to vector<8x32xf32>
    %154 = arith.mulf %144, %153 : vector<8x32xf32>
    %155 = vector.broadcast %137 : vector<1x32xf32> to vector<8x32xf32>
    %156 = arith.mulf %154, %155 : vector<8x32xf32>
    %157 = vector.broadcast %138 : vector<1x32xf32> to vector<8x32xf32>
    %158 = arith.addf %156, %157 : vector<8x32xf32>
    %159 = vector.shape_cast %158 : vector<8x32xf32> to vector<1x8x32xf32>
    %c0_58 = arith.constant 0 : index
    %c0_59 = arith.constant 0 : index
    %c0_60 = arith.constant 0 : index
    %160 = vector.load %arg15[%c0_58, %c0_59, %c0_60] : memref<1x8x32xf32, #tpu.memory_space<vmem>>, vector<1x8x32xf32>
    tpu.vector_store %arg15[%c0_58, %c0_59, %c0_60], %159 {strides = array<i32>} : memref<1x8x32xf32, #tpu.memory_space<vmem>>, vector<1x8x32xf32>,
    return
  }
  func.func @transform_0(%arg0: i32) -> (i32, i32, i32) {
    %c0_i32 = arith.constant 0 : i32
    %c0_i32_0 = arith.constant 0 : i32
    %c0_i32_1 = arith.constant 0 : i32
    return %arg0, %c0_i32, %c0_i32_0 : i32, i32, i32
  }
  func.func @transform_1(%arg0: i32) -> (i32, i32, i32) {
    %c0_i32 = arith.constant 0 : i32
    %c0_i32_0 = arith.constant 0 : i32
    %c0_i32_1 = arith.constant 0 : i32
    return %arg0, %c0_i32, %c0_i32_0 : i32, i32, i32
  }
  func.func @transform_2(%arg0: i32) -> (i32, i32) {
    %c0_i32 = arith.constant 0 : i32
    %c0_i32_0 = arith.constant 0 : i32
    %c0_i32_1 = arith.constant 0 : i32
    return %c0_i32, %c0_i32_0 : i32, i32
  }
  func.func @transform_3(%arg0: i32) -> (i32, i32) {
    %c0_i32 = arith.constant 0 : i32
    %c0_i32_0 = arith.constant 0 : i32
    %c0_i32_1 = arith.constant 0 : i32
    return %c0_i32, %c0_i32_0 : i32, i32
  }
  func.func @transform_4(%arg0: i32) -> (i32, i32, i32) {
    %c0_i32 = arith.constant 0 : i32
    %c0_i32_0 = arith.constant 0 : i32
    %c0_i32_1 = arith.constant 0 : i32
    %c0_i32_2 = arith.constant 0 : i32
    return %c0_i32, %c0_i32_0, %c0_i32_1 : i32, i32, i32
  }
  func.func @transform_5(%arg0: i32) -> (i32, i32) {
    %c0_i32 = arith.constant 0 : i32
    %c0_i32_0 = arith.constant 0 : i32
    %c0_i32_1 = arith.constant 0 : i32
    return %c0_i32, %c0_i32_0 : i32, i32
  }
  func.func @transform_6(%arg0: i32) -> (i32, i32) {
    %c0_i32 = arith.constant 0 : i32
    %c0_i32_0 = arith.constant 0 : i32
    %c0_i32_1 = arith.constant 0 : i32
    return %c0_i32, %c0_i32_0 : i32, i32
  }
  func.func @transform_7(%arg0: i32) -> (i32, i32) {
    %c0_i32 = arith.constant 0 : i32
    %c0_i32_0 = arith.constant 0 : i32
    %c0_i32_1 = arith.constant 0 : i32
    return %c0_i32, %c0_i32_0 : i32, i32
  }
  func.func @transform_8(%arg0: i32) -> (i32, i32) {
    %c0_i32 = arith.constant 0 : i32
    %c0_i32_0 = arith.constant 0 : i32
    %c0_i32_1 = arith.constant 0 : i32
    return %c0_i32, %c0_i32_0 : i32, i32
  }
  func.func @transform_9(%arg0: i32) -> (i32, i32) {
    %c0_i32 = arith.constant 0 : i32
    %c0_i32_0 = arith.constant 0 : i32
    %c0_i32_1 = arith.constant 0 : i32
    return %c0_i32, %c0_i32_0 : i32, i32
  }
  func.func @transform_10(%arg0: i32) -> (i32, i32) {
    %c0_i32 = arith.constant 0 : i32
    %c0_i32_0 = arith.constant 0 : i32
    %c0_i32_1 = arith.constant 0 : i32
    return %c0_i32, %c0_i32_0 : i32, i32
  }
  func.func @transform_11(%arg0: i32) -> (i32, i32) {
    %c0_i32 = arith.constant 0 : i32
    %c0_i32_0 = arith.constant 0 : i32
    %c0_i32_1 = arith.constant 0 : i32
    return %c0_i32, %c0_i32_0 : i32, i32
  }
  func.func @transform_12(%arg0: i32) -> (i32, i32) {
    %c0_i32 = arith.constant 0 : i32
    %c0_i32_0 = arith.constant 0 : i32
    %c0_i32_1 = arith.constant 0 : i32
    return %c0_i32, %c0_i32_0 : i32, i32
  }
  func.func @transform_13(%arg0: i32) -> (i32, i32) {
    %c0_i32 = arith.constant 0 : i32
    %c0_i32_0 = arith.constant 0 : i32
    %c0_i32_1 = arith.constant 0 : i32
    return %c0_i32, %c0_i32_0 : i32, i32
  }
  func.func @transform_14(%arg0: i32) -> (i32, i32, i32) {
    %c0_i32 = arith.constant 0 : i32
    %c0_i32_0 = arith.constant 0 : i32
    %c0_i32_1 = arith.constant 0 : i32
    return %arg0, %c0_i32, %c0_i32_0 : i32, i32, i32
  }
}

</mosaic_0001>

<bundles_post_ra>
// kernel: tpu_custom_call.1
= control target key start
LH: loop header
LB: loop body
LE: loop exit
PB: predicated region body
PF: predicated region fallthrough
CT: control target
= control target key end

     0   :  { %s2300_s0 = inlined_call_operand.vmem [shape: f32[2,8,32], index: 0, kind: input, shape index: {}]   ;;  %s2301_s1 = inlined_call_operand.vmem [shape: f32[2,1,8], index: 1, kind: input, shape index: {}]   ;;  %s2302_s2 = inlined_call_operand.vmem [shape: bf16[32,96], index: 2, kind: input, shape index: {}]   ;;  %s2303_s3 = inlined_call_operand.vmem [shape: f32[1,96], index: 3, kind: input, shape index: {}]   ;;  %s2304_s4 = inlined_call_operand.vmem [shape: bf16[4,8,32], index: 4, kind: input, shape index: {}]   ;;  %s2305_s5 = inlined_call_operand.vmem [shape: f32[1,32], index: 5, kind: input, shape index: {}]   ;;  %s2306_s6 = inlined_call_operand.vmem [shape: f32[1,32], index: 6, kind: input, shape index: {}]   ;;  %s2307_s7 = inlined_call_operand.vmem [shape: f32[1,32], index: 7, kind: input, shape index: {}]   ;;  %s2308_s8 = inlined_call_operand.hbm [shape: bf16[32,64], index: 8, kind: input, shape index: {}]   ;;  %s2309_s9 = inlined_call_operand.vmem [shape: f32[1,64], index: 9, kind: input, shape index: {}]   ;;  %s2310_s10 = inlined_call_operand.vmem [shape: bf16[64,32], index: 10, kind: input, shape index: {}]   ;;  %s2311_s11 = inlined_call_operand.vmem [shape: f32[1,32], index: 11, kind: input, shape index: {}]   ;;  %s2312_s12 = inlined_call_operand.vmem [shape: f32[1,32], index: 12, kind: input, shape index: {}]   ;;  %s2313_s13 = inlined_call_operand.vmem [shape: f32[1,32], index: 13, kind: input, shape index: {}]   ;;  %s2314_s14 = inlined_call_operand.hbm [shape: f32[2,8,32], index: 14, kind: output, shape index: {}]  }
   0x1   :  { %2322 = sst [smem:[#allocation12_spill]] %s2300_s0 }
   0x2   :  { %19 = vsyncpa [#allocation3], 0 }
   0x3   :  { %20 = vsyncpa [#allocation4], 0 }
   0x4   :  { %22 = vsyncpa [#allocation4 + $0x1], 0  ;;  %s1983_s29 = smov 0   ;;  %s1985_s30 = smov 0  }
   0x5   :  { %s1987_s15 = smov 0   ;;  %s1989_s16 = smov 0  }
   0x6 LB: > { %2323 = sst [smem:[#allocation8_spill]] %s1891_s15  ;;  %s2004_s17 = sadd.s32 4294967295, %s1895_s16   ;;  %s1895_s16 = sphi %s1989_s16, %s2338_s16   ;;  %s1891_s15 = sphi %s1987_s15, %s2340_s15   ;;  %s1887_s30 = sphi %s1985_s30, %s2342_s30   ;;  %s1883_s29 = sphi %s1983_s29, %s2341_s29  }
   0x7   : > { %s1532_s18 = sadd.s32 4294967294, %s1895_s16   ;;  %s2008_s19 = sadd.s32 1, %s1895_s16  }
   0x8   : > { %2324 = sst [smem:[#allocation9_spill]] %s2008_s19  ;;  %s339_s20 = sadd.s32 1, %s1891_s15 }
   0x9   : > { %s336_s21 = ssub.s32 %s1895_s16, %s2008_s19  ;;  %p349_p0 = scmp.ne.s32.totalorder %s1891_s15, %s1887_s30 }
   0xa   : > { %p337_p1 = scmp.eq.s32.totalorder %s336_s21, 0  ;;  %p350_p2 = scmp.eq.s32.totalorder %s2004_s17, 1 }
   0xb   : > { %p355_p3 = scmp.ne.s32.totalorder %s1887_s30, %s1883_s29  ;;  %p356_p4 = scmp.eq.s32.totalorder %s1532_s18, 1 }
   0xc   : > { %s2019_s22 = scalar_select %p337_p1, %s1891_s15, %s339_s20  }
   0xd   : > { %p2021_p5 = por %p350_p2, %p349_p0  ;;  %p2025_p6 = por %p356_p4, %p355_p3 }
   0xe   : > { %2325 = sst [smem:[#allocation10_spill]] %s2019_s22  ;;  %p1533_p7 = scmp.ge.s32.totalorder %s1895_s16, 1 }
   0xf   : > { %s2326_s23 = scalar_select %p2021_p5, 1, 0 }
  0x10   : > { %s2327_s24 = scalar_select %p2025_p6, 1, 0 }
  0x11   : > { %p363_p8 = scmp.lt.s32.totalorder %s1895_s16, 3  ;;  %p2319_p9 = scmp.eq.s32.totalorder %s2004_s17, 0 }
  0x12   : > { %2328 = sst [smem:[#allocation11_spill]] %s2327_s24  ;;  %s1897_s26 = smov [#allocation2]  }
  0x13   : > { %p2032_p10 = pnand %p1533_p7, %p363_p8  ;;  %s393_s27 = sshll.u32 %s1897_s26, 4  ;;  %s394_s27 = int_to_ptr.vmem [resolvable:$true] %s393_s27 }
  0x14   : > { %s1801_s21 = scalar_lea.hbm %s2308_s8, 256 }
  0x15   : > { %s2329_s25 = scalar_select %p2032_p10, 1, 0 }
  0x16   : > { %p1720_p11 = pneg %p2032_p10  ;;  %p1802_p13 = scmp.ne.s32.totalorder %s2308_s8, %s1801_s21 }
  0x17   : > { %p1808_p3 = scmp.lt.u32.totalorder %s1801_s21, %s2308_s8 }
  0x18   : > { %p2040_p12 = pnand %p2319_p9, %p1720_p11 }
  0x1a   : > { %p1803_p0 = pneg %p2040_p12 }
  0x1c   : > { %p1804_p1 = pnand %p1803_p0, %p1802_p13 }
  0x1e   : > { %p1805_p2 = pneg %p1804_p1 }
  0x20   : > { %p1810_p4 = pnand %p1808_p3, %p1805_p2 }
  0x22   : > { %1813 = shalt.err (!%p1810_p4)
}
  0x23   : > { %s1814_s24 = scalar_lea.vmem %s394_s27, 256  ;;  %p1822_p9 = scmp.lt.s32.totalorder %s394_s27, %s394_s27 }
  0x24   : > { %p1815_p7 = scmp.ne.s32.totalorder %s394_s27, %s1814_s24  ;;  %p1823_p6 = scmp.lt.s32.totalorder %s1814_s24, %s1814_s24 }
  0x26   : > { %p1817_p8 = pnand %p1815_p7, %p1803_p0  ;;  %p1824_p5 = por %p1823_p6, %p1822_p9 }
  0x28   : > { %p1818_p11 = pneg %p1817_p8 }
  0x2a   : > { %p1825_p10 = pnand %p1824_p5, %p1818_p11 }
  0x2c   : > { %1828 = shalt.err (!%p1825_p10)
}
  0x2d   : > { %s1898_s15 = smov 64   ;;  %s1899_s22 = smov 4  }
  0x2e   : > { %1723 = dma.hbm_to_vmem [thread:$0]  (!%p2040_p12), %s2308_s8, 256, %s394_s27, [#allocation3], %s1898_s15, %s1898_s15, %s1899_s22  }
  0x2f   : > { %p2331_p13 = scmp.ne.s32.totalorder %s2329_s25, 0 }
  0x30   : > { %p2332_p1 = scmp.eq.s32.totalorder (!%p2331_p13), %s2004_s17, 0 }
  0x31   : > { %437 = sbr.rel (%p2331_p13) target bundleno = 2571 (0xa0b), region = 76 }
  0x38   : > { %1874 = dma.done.wait (%p2332_p1), [#allocation3], 256   ;;  %p2333_p0 = pmov %p2332_p1 }
  0x39   : > { %p485_p5 = scmp.lt.s32.totalorder %s2004_s17, 1  ;;  %v1900_v0 = vmov 0.0   ;;  %vm1901_vm0 = vmmov 0   ;;  %s2334_s0 = sld [smem:[#allocation12_spill]]  ;;  %v1773_v1 = vld [vmem:[%s2302_s2] sm:$0xff]   ;;  %v1774_v2 = vld [vmem:[%s2302_s2 + $0x8] sm:$0xff]  }
  0x3a   : > { %1876 = vsyncadd (%p2333_p0), [#allocation3], 4294967040  ;;  %1614 = vmatprep.subr.bf16.mxu1 %v1900_v0  ;;  %1618 = vmatprep.mubr.msk.bf16.mxu1 %vm1901_vm0, %v1900_v0  ;;  %vm518_vm1 = vcmask 261120   ;;  %v1540_v5 = vld [vmem:[%s2303_s3] ss:$0 sm:$0xff]  ;;  %s1903_s25 = smov 120  }
  0x3b   : > { %s2071_s19 = scalar_select %p485_p5, %s2004_s17, 1  ;;  %1628 = vmatprep.subr.bf16.mxu0 %v1900_v0  ;;  %1630 = vmatprep.mubr.msk.bf16.mxu0 %vm1901_vm0, %v1900_v0  ;;  %vm573_vm2 = vcmask 64512   ;;  %vm831_vm3 = vcmask 1043456   ;;  %vm1363_vm4 = vcmask 523264  }
  0x3c   : > { %1615 = vmatpush3.bf16.msra.mxu1 %v1773_v1  ;;  %s1904_s27 = smov 96   ;;  %p2335_p9 = scmp.ne.s32.totalorder %s2326_s23, 0 }
  0x3d   : > { %s1539_s24 = sshll.u32 %s2071_s19, 3  ;;  %1616 = vmatprep.subr.bf16.mxu1 %v1900_v0  ;;  %s491_s15 = scalar_lea.vmem %s2301_s1, %s2071_s19 }
  0x3e   : > { %v1548_v24 = vld [vmem:[%s491_s15] ss:$0 sm:$0xff]  ;;  %s1906_s19 = smov 64  }
  0x3f   : > { %s488_s28 = scalar_lea.vmem %s2334_s0, %s1539_s24  ;;  %s1902_s24 = smov 104  }
  0x40   : > { %v2086_v3 = vld [vmem:[%s488_s28] sm:$0xff]  ;;  %1617 = vmatpush3.bf16.msra.mxu1 %v1774_v2  ;;  %s1905_s28 = smov 112  }
  0x41   : > { %v494_v4 = vpack.c.bf16 %v2086_v3, %v2086_v3  ;;  %1622 = vmatprep.subr.bf16.mxu1 %v1900_v0 }
  0x43   : > { %1619 = vmatmul.mubr.msk.bf16.vlgmr.msra.gmra.mrb[0].mxu1 %vm518_vm1, %v494_v4 }
  0x44   : > { %1624 = vmatprep.mubr.msk.bf16.mxu1 %vm1901_vm0, %v1900_v0 }
 0x116   : > { %v556_v6 = vpop.f32.mrb[0].mxu1 }
 0x117   : > { %v557_v7 = vadd.f32 %v1540_v5, %v556_v6  ;;  %v1620_v8 = vpop.f32.mrb[1].mxu1 }
 0x118   : > { %v559_v9 = vpop.f32.mrb[2].mxu1 }
 0x119   : > { %v2098_v10 = vpack.c.bf16 %v557_v7, %v557_v7  ;;  %v1621_v11 = vpop.f32.mrb[3].mxu1 }
 0x11b   : > { %568 = vrot.lane.b32.xlu1 %v2098_v10, %s1902_s24  ;;  %564 = vrot.lane.b32.xlu0 %v2098_v10, %s1903_s25  ;;  %s482_s25 = sand.u32 1, %s1887_s30  }
 0x11f   : > { %571 = vrot.lane.b32.xlu1 %v2098_v10, %s1904_s27  ;;  %566 = vrot.lane.b32.xlu0 %v2098_v10, %s1905_s28  ;;  %s1439_s28 = scalar_lea.sflag [#allocation4], %s482_s25 }
 0x18d   : > { %v2104_v12 = vpop.permute.xlu1 %568  ;;  %v2106_v13 = vpop.permute.xlu0 %564 }
 0x18e   : > { %620 = vrot.lane.b32.xlu0 %v2106_v13, %s1904_s27 }
 0x191   : > { %v572_v14 = vpop.permute.xlu1 %571  ;;  %v2109_v15 = vpop.permute.xlu0 %566 }
 0x192   : > { %v578_v16 = vsel %vm573_vm2, %v572_v14, 0  ;;  %716 = vrot.lane.b32.xlu0 %v2104_v12, %s1904_s27  ;;  %668 = vrot.lane.b32.xlu1 %v2109_v15, %s1904_s27  ;;  %s1538_s27 = sshll.u32 %s482_s25, 3 }
 0x193   : > { %1623 = vmatpush3.bf16.xpose.msra.mxu1 %v578_v16  ;;  %s484_s22 = scalar_lea.vmem [#allocation5], %s1538_s27 }
 0x194   : > { %1634 = vmatprep.subr.bf16.mxu1 %v1900_v0  ;;  %s1452_s18 = sshll.u32 %s484_s22, 4  ;;  %s2259_s18 = int_to_ptr.vmem [resolvable:$true] %s1452_s18 }
 0x195   : > { %s1829_s21 = scalar_lea.vmem %s2259_s18, 128 }
 0x196   : > { %p1830_p6 = scmp.ne.s32.totalorder %s2259_s18, %s1829_s21 }
 0x198   : > { %p1831_p10 = pnand %p1830_p6, %p2335_p9 }
 0x19a   : > { %1625 = vmatmul.mubr.msk.bf16.vlgmr.msra.gmra.mrb[4].mxu1 %vm573_vm2, %v2098_v10  ;;  %p1832_p12 = pneg %p1831_p10 }
 0x19b   : > { %1636 = vmatprep.mubr.msk.bf16.mxu1 %vm1901_vm0, %v1900_v0 }
 0x200   : > { %v621_v17 = vpop.permute.xlu0 %620 }
 0x201   : > { %v626_v18 = vsel %vm573_vm2, %v621_v17, 0 }
 0x202   : > { %1629 = vmatpush3.bf16.xpose.msra.mxu0 %v626_v18 }
 0x203   : > { %1640 = vmatprep.subr.bf16.mxu0 %v1900_v0 }
 0x204   : > { %v669_v19 = vpop.permute.xlu1 %668  ;;  %v717_v21 = vpop.permute.xlu0 %716 }
 0x205   : > { %v674_v20 = vsel %vm573_vm2, %v669_v19, 0  ;;  %v722_v22 = vsel %vm573_vm2, %v717_v21, 0 }
 0x206   : > { %1635 = vmatpush3.bf16.xpose.msra.mxu1 %v674_v20 }
 0x207   : > { %1646 = vmatprep.subr.bf16.mxu1 %v1900_v0 }
 0x209   : > { %1631 = vmatmul.mubr.msk.bf16.vlgmr.msra.gmra.mrb[0].mxu0 %vm573_vm2, %v2106_v13 }
 0x20a   : > { %1641 = vmatpush3.bf16.xpose.msra.mxu0 %v722_v22  ;;  %1642 = vmatprep.mubr.msk.bf16.mxu0 %vm1901_vm0, %v1900_v0 }
 0x20b   : > { %1652 = vmatprep.subr.bf16.mxu0 %v1900_v0 }
 0x20d   : > { %1637 = vmatmul.mubr.msk.bf16.vlgmr.msra.gmra.mrb[8].mxu1 %vm573_vm2, %v2109_v15 }
 0x20e   : > { %1648 = vmatprep.mubr.msk.bf16.mxu1 %vm1901_vm0, %v1900_v0 }
 0x211   : > { %1643 = vmatmul.mubr.msk.bf16.vlgmr.msra.gmra.mrb[4].mxu0 %vm573_vm2, %v2104_v12 }
 0x212   : > { %1654 = vmatprep.mubr.msk.bf16.mxu0 %vm1901_vm0, %v1900_v0 }
 0x26d   : > { %v614_v23 = vpop.f32.mrb[4].mxu1 }
 0x26e   : > { %v764_v25 = vmul.f32 0.35355338, %v614_v23  ;;  %v1626_v26 = vpop.f32.mrb[5].mxu1 }
 0x26f   : > { %v617_v27 = vpop.f32.mrb[6].mxu1 }
 0x270   : > { %v1627_v28 = vpop.f32.mrb[7].mxu1  ;;  %v774_v29 = vadd.f32 %v1548_v24, %v764_v25 }
 0x271   : > { %v1553_v28 = vld [vmem:[%s2304_s4 + $0x4] sm:$0xf] }
 0x272   : > { %v778_v30 = vsel %vm573_vm2, %v774_v29, -inf }
 0x273   : > { %779 = vmax.xlane.f32.xlu1 %v778_v30 }
 0x2dc   : > { %v662_v31 = vpop.f32.mrb[0].mxu0 }
 0x2dd   : > { %v765_v32 = vmul.f32 0.35355338, %v662_v31  ;;  %v1632_v33 = vpop.f32.mrb[1].mxu0 }
 0x2de   : > { %v665_v34 = vpop.f32.mrb[2].mxu0 }
 0x2df   : > { %v1633_v35 = vpop.f32.mrb[3].mxu0  ;;  %v775_v36 = vadd.f32 %v1548_v24, %v765_v32  ;;  %v1030_v32 = vsel %vm831_vm3, %v1553_v28, 0  ;;  %v1023_v34 = vld [vmem:[%s2304_s4] sm:$0xf] }
 0x2e0   : > { %v710_v37 = vpop.f32.mrb[8].mxu1  ;;  %v1775_v28 = vld [vmem:[#allocation2] sm:$0xff]  }
 0x2e1   : > { %v766_v38 = vmul.f32 0.35355338, %v710_v37  ;;  %v1638_v39 = vpop.f32.mrb[9].mxu1  ;;  %v781_v40 = vsel %vm573_vm2, %v775_v36, -inf  ;;  %v1076_v37 = vsel %vm831_vm3, %v1023_v34, 0 }
 0x2e2   : > { %782 = vmax.xlane.f32.xlu0 %v781_v40  ;;  %v713_v41 = vpop.f32.mrb[10].mxu1 }
 0x2e3   : > { %v1639_v42 = vpop.f32.mrb[11].mxu1  ;;  %v776_v43 = vadd.f32 %v1548_v24, %v766_v38  ;;  %v1558_v38 = vld [vmem:[%s2304_s4 + $0xc] sm:$0xf] }
 0x2e4   : > { %v758_v44 = vpop.f32.mrb[4].mxu0  ;;  %v1173_v42 = vsel %vm831_vm3, %v1558_v38, 0 }
 0x2e5   : > { %v767_v45 = vmul.f32 0.35355338, %v758_v44  ;;  %v1644_v46 = vpop.f32.mrb[5].mxu0  ;;  %v784_v47 = vsel %vm573_vm2, %v776_v43, -inf }
 0x2e6   : > { %v761_v48 = vpop.f32.mrb[6].mxu0  ;;  %785 = vmax.xlane.f32.xlu0 %v784_v47 }
 0x2e7   : > { %v1645_v49 = vpop.f32.mrb[7].mxu0  ;;  %v777_v50 = vadd.f32 %v1548_v24, %v767_v45  ;;  %v1556_v45 = vld [vmem:[%s2304_s4 + $0x8] sm:$0xf] }
 0x2e8   : > { %v1124_v49 = vsel %vm831_vm3, %v1556_v45, 0 }
 0x2e9   : > { %v787_v51 = vsel %vm573_vm2, %v777_v50, -inf }
 0x2ea   : > { %788 = vmax.xlane.f32.xlu1 %v787_v51 }
 0x2fb   : > { %875 = vrot.lane.b32.xlu1 %v2106_v13, %s1906_s19 }
 0x2fc   : > { %826 = vrot.lane.b32.xlu0 %v2098_v10, %s1906_s19 }
 0x300   : > { %v780_v52 = vpop.xlane.xlu1 %779 }
 0x301   : > { %v790_v53 = vsub.f32 %v774_v29, %v780_v52 }
 0x303   : > { %v794_v54 = vmul.f32 1.442695, %v790_v53 }
 0x305   : > { %1781 = vpow2.f32 %v794_v54 }
 0x30f   : > { %v1782_v55 = vpop.eup %1781 }
 0x310   : > { %v802_v56 = vsel %vm573_vm2, %v1782_v55, 0.0 }
 0x31b   : > { %803 = vadd.xlane.f32.xlu0 %v802_v56 }
 0x36f   : > { %v783_v57 = vpop.xlane.xlu0 %782 }
 0x370   : > { %v791_v58 = vsub.f32 %v775_v36, %v783_v57 }
 0x372   : > { %v796_v59 = vmul.f32 1.442695, %v791_v58 }
 0x373   : > { %v786_v60 = vpop.xlane.xlu0 %785 }
 0x374   : > { %1783 = vpow2.f32 %v796_v59  ;;  %v792_v61 = vsub.f32 %v776_v43, %v786_v60 }
 0x376   : > { %v798_v62 = vmul.f32 1.442695, %v792_v61 }
 0x377   : > { %v789_v63 = vpop.xlane.xlu1 %788  ;;  %v827_v1 = vpop.permute.xlu0 %826 }
 0x378   : > { %1785 = vpow2.f32 %v798_v62  ;;  %v793_v2 = vsub.f32 %v777_v50, %v789_v63  ;;  %v833_v4 = vsel %vm831_vm3, %v827_v1, 0 }
 0x379   : > { %1647 = vmatpush3.bf16.msra.mxu1 %v833_v4 }
 0x37a   : > { %v800_v5 = vmul.f32 1.442695, %v793_v2  ;;  %1658 = vmatprep.subr.bf16.mxu1 %v1900_v0 }
 0x37b   : > { %v876_v6 = vpop.permute.xlu1 %875 }
 0x37c   : > { %1787 = vpow2.f32 %v800_v5  ;;  %v881_v7 = vsel %vm831_vm3, %v876_v6, 0 }
 0x37d   : > { %1653 = vmatpush3.bf16.msra.mxu0 %v881_v7 }
 0x37e   : > { %v1784_v8 = vpop.eup %1783  ;;  %1664 = vmatprep.subr.bf16.mxu0 %v1900_v0 }
 0x37f   : > { %v805_v9 = vsel %vm573_vm2, %v1784_v8, 0.0 }
 0x380   : > { %806 = vadd.xlane.f32.xlu1 %v805_v9 }
 0x382   : > { %v1786_v10 = vpop.eup %1785 }
 0x383   : > { %v808_v11 = vsel %vm573_vm2, %v1786_v10, 0.0 }
 0x384   : > { %809 = vadd.xlane.f32.xlu0 %v808_v11 }
 0x386   : > { %v1788_v13 = vpop.eup %1787 }
 0x387   : > { %v811_v14 = vsel %vm573_vm2, %v1788_v13, 0.0 }
 0x388   : > { %812 = vadd.xlane.f32.xlu1 %v811_v14 }
 0x399   : > { %923 = vrot.lane.b32.xlu1 %v2109_v15, %s1906_s19 }
 0x39a   : > { %971 = vrot.lane.b32.xlu0 %v2104_v12, %s1906_s19  ;;  %s1576_s19 = sshll.u32 %s2004_s17, 7  ;;  %s1907_s17 = smov [#allocation5]  }
 0x39b   : > { %s2257_s0 = scalar_lea.hbm %s2314_s14, %s1576_s19  ;;  %s1833_s27 = sshll.u32 %s1907_s17, 4  ;;  %s1834_s27 = int_to_ptr.vmem [resolvable:$false] %s1833_s27 }
 0x39c   : > { %s1835_s26 = scalar_lea.vmem %s1834_s27, 256  ;;  %p1836_p2 = scmp.lt.s32.totalorder %s2259_s18, %s1834_s27 }
 0x39d   : > { %p1837_p3 = scmp.lt.s32.totalorder %s1835_s26, %s1829_s21 }
 0x39f   : > { %p1838_p4 = por %p1837_p3, %p1836_p2 }
 0x3a1   : > { %p1839_p7 = pnand %p1838_p4, %p1832_p12 }
 0x3a8   : > { %v804_v16 = vpop.xlane.xlu0 %803 }
 0x3a9   : > { %1789 = vrcp.f32 %v804_v16  ;;  %v1560_v16 = vld [vmem:[%s2305_s5] ss:$0 sm:$0xff] }
 0x3b3   : > { %v1790_v17 = vpop.eup %1789 }
 0x3b4   : > { %v818_v18 = vmul.f32 %v1790_v17, %v1782_v55 }
 0x3b6   : > { %v822_v19 = vpack.c.bf16 %v818_v18, %v818_v18 }
 0x3b8   : > { %1649 = vmatmul.mubr.msk.bf16.vlgmr.msra.gmra.mrb[12].mxu1 %vm573_vm2, %v822_v19 }
 0x3b9   : > { %1660 = vmatprep.mubr.msk.bf16.mxu1 %vm1901_vm0, %v1900_v0 }
 0x40d   : > { %v807_v20 = vpop.xlane.xlu1 %806 }
 0x40e   : > { %1791 = vrcp.f32 %v807_v20 }
 0x411   : > { %v810_v21 = vpop.xlane.xlu0 %809 }
 0x412   : > { %1793 = vrcp.f32 %v810_v21 }
 0x415   : > { %v813_v22 = vpop.xlane.xlu1 %812  ;;  %v972_v12 = vpop.permute.xlu0 %971 }
 0x416   : > { %1795 = vrcp.f32 %v813_v22  ;;  %v977_v30 = vsel %vm831_vm3, %v972_v12, 0 }
 0x418   : > { %v1792_v15 = vpop.eup %1791 }
 0x419   : > { %v819_v23 = vmul.f32 %v1792_v15, %v1784_v8  ;;  %v924_v24 = vpop.permute.xlu1 %923 }
 0x41a   : > { %v929_v25 = vsel %vm831_vm3, %v924_v24, 0 }
 0x41b   : > { %1659 = vmatpush3.bf16.msra.mxu1 %v929_v25  ;;  %v823_v26 = vpack.c.bf16 %v819_v23, %v819_v23 }
 0x41c   : > { %v1794_v27 = vpop.eup %1793  ;;  %1670 = vmatprep.subr.bf16.mxu1 %v1900_v0 }
 0x41d   : > { %v820_v29 = vmul.f32 %v1794_v27, %v1786_v10  ;;  %1655 = vmatmul.mubr.msk.bf16.vlgmr.msra.gmra.mrb[8].mxu0 %vm573_vm2, %v823_v26 }
 0x41e   : > { %1665 = vmatpush3.bf16.msra.mxu0 %v977_v30  ;;  %1666 = vmatprep.mubr.msk.bf16.mxu0 %vm1901_vm0, %v1900_v0  ;;  %v1778_v30 = vld [vmem:[%s2310_s10 + $0x8] sm:$0xff]  }
 0x41f   : > { %v824_v31 = vpack.c.bf16 %v820_v29, %v820_v29  ;;  %1676 = vmatprep.subr.bf16.mxu0 %v1900_v0  ;;  %v1776_v29 = vld [vmem:[#allocation2 + $0x8] sm:$0xff]  }
 0x420   : > { %v1796_v33 = vpop.eup %1795 }
 0x421   : > { %v821_v35 = vmul.f32 %v1796_v33, %v1788_v13  ;;  %1661 = vmatmul.mubr.msk.bf16.vlgmr.msra.gmra.mrb[16].mxu1 %vm573_vm2, %v824_v31 }
 0x422   : > { %1671 = vmatpush3.bf16.msra.mxu1 %v1030_v32  ;;  %1672 = vmatprep.mubr.msk.bf16.mxu1 %vm1901_vm0, %v1900_v0 }
 0x423   : > { %v825_v36 = vpack.c.bf16 %v821_v35, %v821_v35  ;;  %1682 = vmatprep.subr.bf16.mxu1 %v1900_v0  ;;  %v1561_v35 = vld [vmem:[%s2306_s6] ss:$0 sm:$0xff] }
 0x425   : > { %1667 = vmatmul.mubr.msk.bf16.vlgmr.msra.gmra.mrb[12].mxu0 %vm573_vm2, %v825_v36 }
 0x426   : > { %1677 = vmatpush3.bf16.msra.mxu0 %v1076_v37  ;;  %1678 = vmatprep.mubr.msk.bf16.mxu0 %vm1901_vm0, %v1900_v0  ;;  %v1562_v37 = vld [vmem:[%s2307_s7] ss:$0 sm:$0xff] }
 0x427   : > { %1688 = vmatprep.subr.bf16.mxu0 %v1900_v0 }
 0x48b   : > { %v869_v39 = vpop.f32.mrb[12].mxu1 }
 0x48c   : > { %v1019_v40 = vpack.c.bf16 %v869_v39, %v869_v39  ;;  %v1650_v41 = vpop.f32.mrb[13].mxu1 }
 0x48d   : > { %v872_v43 = vpop.f32.mrb[14].mxu1  ;;  %v1779_v41 = vld [vmem:[%s2310_s10 + $0x10] sm:$0xff]  }
 0x48e   : > { %v1651_v44 = vpop.f32.mrb[15].mxu1  ;;  %1679 = vmatmul.mubr.msk.bf16.vlgmr.msra.gmra.mrb[16].mxu0 %vm573_vm2, %v1019_v40  ;;  %v1563_v43 = vld [vmem:[%s2309_s9] ss:$0 sm:$0xff] }
 0x48f   : > { %1689 = vmatpush3.bf16.msra.mxu0 %v1173_v42  ;;  %1690 = vmatprep.mubr.msk.bf16.mxu0 %vm1901_vm0, %v1900_v0  ;;  %v1780_v42 = vld [vmem:[%s2310_s10 + $0x18] sm:$0xff]  }
 0x490   : > { %1702 = vmatprep.subr.bf16.mxu0 %v1900_v0 }
 0x4f0   : > { %v917_v46 = vpop.f32.mrb[8].mxu0 }
 0x4f1   : > { %v1020_v47 = vpack.c.bf16 %v917_v46, %v917_v46  ;;  %v1656_v48 = vpop.f32.mrb[9].mxu0 }
 0x4f2   : > { %v920_v50 = vpop.f32.mrb[10].mxu0 }
 0x4f3   : > { %v1657_v51 = vpop.f32.mrb[11].mxu0  ;;  %1673 = vmatmul.mubr.msk.bf16.vlgmr.msra.gmra.mrb[20].mxu1 %vm573_vm2, %v1020_v47 }
 0x4f4   : > { %1683 = vmatpush3.bf16.msra.mxu1 %v1124_v49  ;;  %v965_v52 = vpop.f32.mrb[16].mxu1  ;;  %1684 = vmatprep.mubr.msk.bf16.mxu1 %vm1901_vm0, %v1900_v0 }
 0x4f5   : > { %v1662_v53 = vpop.f32.mrb[17].mxu1  ;;  %1694 = vmatprep.subr.bf16.mxu1 %v1900_v0  ;;  %v1021_v57 = vpack.c.bf16 %v965_v52, %v965_v52 }
 0x4f6   : > { %v968_v54 = vpop.f32.mrb[18].mxu1 }
 0x4f7   : > { %v1663_v55 = vpop.f32.mrb[19].mxu1 }
 0x4f8   : > { %v1013_v56 = vpop.f32.mrb[12].mxu0 }
 0x4f9   : > { %v1022_v58 = vpack.c.bf16 %v1013_v56, %v1013_v56  ;;  %v1668_v59 = vpop.f32.mrb[13].mxu0 }
 0x4fa   : > { %v1016_v60 = vpop.f32.mrb[14].mxu0 }
 0x4fb   : > { %v1669_v61 = vpop.f32.mrb[15].mxu0  ;;  %1685 = vmatmul.mubr.msk.bf16.vlgmr.msra.gmra.mrb[24].mxu1 %vm573_vm2, %v1021_v57  ;;  %1691 = vmatmul.mubr.msk.bf16.vlgmr.msra.gmra.mrb[20].mxu0 %vm573_vm2, %v1022_v58 }
 0x4fc   : > { %1698 = vmatprep.mubr.msk.bf16.mxu1 %vm1901_vm0, %v1900_v0  ;;  %1710 = vmatprep.mubr.msk.bf16.mxu0 %vm1901_vm0, %v1900_v0 }
 0x4fd   : > { %1695 = vmatpush3.bf16.msra.mxu1 %v1775_v28 }
 0x4fe   : > { %1696 = vmatprep.subr.bf16.mxu1 %v1900_v0 }
 0x501   : > { %1697 = vmatpush3.bf16.msra.mxu1 %v1776_v29 }
 0x561   : > { %v1112_v62 = vpop.f32.mrb[16].mxu0 }
 0x562   : > { %v1680_v63 = vpop.f32.mrb[17].mxu0 }
 0x563   : > { %v1115_v1 = vpop.f32.mrb[18].mxu0 }
 0x564   : > { %v1681_v2 = vpop.f32.mrb[19].mxu0 }
 0x5c6   : > { %v1066_v4 = vpop.f32.mrb[20].mxu1 }
 0x5c7   : > { %v1113_v5 = vadd.f32 %v1112_v62, %v1066_v4  ;;  %v1674_v6 = vpop.f32.mrb[21].mxu1 }
 0x5c8   : > { %v1069_v7 = vpop.f32.mrb[22].mxu1 }
 0x5c9   : > { %v1675_v8 = vpop.f32.mrb[23].mxu1  ;;  %v1574_v7 = vld [vmem:[%s2313_s13] ss:$0 sm:$0xff] }
 0x5ce   : > { %v1160_v9 = vpop.f32.mrb[24].mxu1  ;;  %v1209_v10 = vpop.f32.mrb[20].mxu0 }
 0x5cf   : > { %v1166_v11 = vadd.f32 %v1160_v9, %v1113_v5  ;;  %v1686_v13 = vpop.f32.mrb[25].mxu1  ;;  %v1692_v14 = vpop.f32.mrb[21].mxu0  ;;  %v1573_v5 = vld [vmem:[%s2312_s12] ss:$0 sm:$0xff] }
 0x5d0   : > { %v1163_v17 = vpop.f32.mrb[26].mxu1  ;;  %v1212_v18 = vpop.f32.mrb[22].mxu0 }
 0x5d1   : > { %v1215_v19 = vadd.f32 %v1209_v10, %v1166_v11  ;;  %v1687_v20 = vpop.f32.mrb[27].mxu1  ;;  %v1693_v21 = vpop.f32.mrb[23].mxu0 }
 0x5d3   : > { %v1223_v22 = vadd.f32 %v1560_v16, %v1215_v19 }
 0x5d5   : > { %v1224_v15 = vadd.f32 %v1223_v22, %v2086_v3  ;;  %v1777_v3 = vld [vmem:[%s2310_s10] sm:$0xff]  }
 0x5d6   : > { %1703 = vmatpush3.bf16.msra.mxu0 %v1777_v3 }
 0x5d7   : > { %v1227_v23 = vsel %vm518_vm1, %v1224_v15, 0.0  ;;  %1704 = vmatprep.subr.bf16.mxu0 %v1900_v0 }
 0x5d8   : > { %1228 = vadd.xlane.f32.xlu1 %v1227_v23 }
 0x5da   : > { %1705 = vmatpush3.bf16.msra.mxu0 %v1778_v30 }
 0x5db   : > { %1706 = vmatprep.subr.bf16.mxu0 %v1900_v0 }
 0x5de   : > { %1707 = vmatpush3.bf16.msra.mxu0 %v1779_v41 }
 0x5df   : > { %1708 = vmatprep.subr.bf16.mxu0 %v1900_v0  ;;  %v1567_v0 = vld [vmem:[%s2311_s11] ss:$0 sm:$0xff] }
 0x5e2   : > { %1709 = vmatpush3.bf16.msra.mxu0 %v1780_v42 }
 0x665   : > { %v1229_v24 = vpop.xlane.xlu1 %1228 }
 0x666   : > { %v1231_v12 = vmul.f32 0.03125, %v1229_v24 }
 0x668   : > { %v1232_v25 = vsub.f32 %v1224_v15, %v1231_v12 }
 0x66a   : > { %v1233_v26 = vmul.f32 %v1232_v25, %v1232_v25 }
 0x66c   : > { %v1234_v27 = vsel %vm518_vm1, %v1233_v26, 0.0 }
 0x66d   : > { %1235 = vadd.xlane.f32.xlu0 %v1234_v27 }
 0x6fa   : > { %v1236_v31 = vpop.xlane.xlu0 %1235 }
 0x6fb   : > { %v1237_v32 = vmul.f32 0.03125, %v1236_v31 }
 0x6fd   : > { %v1238_v33 = vadd.f32 1e-05, %v1237_v32 }
 0x6ff   : > { %1797 = vrsqrt.f32 %v1238_v33 }
 0x709   : > { %v1798_v34 = vpop.eup %1797 }
 0x70a   : > { %v1240_v36 = vmul.f32 %v1798_v34, %v1232_v25 }
 0x70c   : > { %v1247_v38 = vmul.f32 %v1561_v35, %v1240_v36 }
 0x70e   : > { %v1254_v39 = vadd.f32 %v1562_v37, %v1247_v38 }
 0x710   : > { %v1255_v40 = vpack.c.bf16 %v1254_v39, %v1254_v39 }
 0x712   : > { %1699 = vmatmul.mubr.msk.bf16.vlgmr.msra.gmra.mrb[28].mxu1 %vm518_vm1, %v1255_v40 }
 0x7e5   : > { %v1316_v44 = vpop.f32.mrb[28].mxu1 }
 0x7e6   : > { %v1317_v45 = vadd.f32 %v1563_v43, %v1316_v44  ;;  %v1700_v46 = vpop.f32.mrb[29].mxu1 }
 0x7e7   : > { %v1319_v47 = vpop.f32.mrb[30].mxu1 }
 0x7e8   : > { %v1322_v48 = vmax.f32 %v1317_v45, 0.0  ;;  %v1701_v49 = vpop.f32.mrb[31].mxu1 }
 0x7ea   : > { %v1323_v50 = vpack.c.bf16 %v1322_v48, %v1322_v48 }
 0x7ec   : > { %1711 = vmatmul.mubr.msk.bf16.vlgmr.msra.gmra.mrb[24].mxu0 %vm1363_vm4, %v1323_v50 }
 0x8bf   : > { %v1401_v51 = vpop.f32.mrb[24].mxu0 }
 0x8c0   : > { %v1402_v52 = vadd.f32 %v1567_v0, %v1401_v51  ;;  %v1712_v53 = vpop.f32.mrb[25].mxu0 }
 0x8c1   : > { %v1404_v54 = vpop.f32.mrb[26].mxu0 }
 0x8c2   : > { %v1713_v55 = vpop.f32.mrb[27].mxu0  ;;  %v1407_v56 = vadd.f32 %v1402_v52, %v1254_v39 }
 0x8c4   : > { %v1410_v57 = vsel %vm518_vm1, %v1407_v56, 0.0 }
 0x8c5   : > { %1411 = vadd.xlane.f32.xlu0 %v1410_v57 }
 0x952   : > { %v1412_v58 = vpop.xlane.xlu0 %1411 }
 0x953   : > { %v1413_v59 = vmul.f32 0.03125, %v1412_v58 }
 0x955   : > { %v1414_v60 = vsub.f32 %v1407_v56, %v1413_v59 }
 0x957   : > { %v1415_v61 = vmul.f32 %v1414_v60, %v1414_v60 }
 0x959   : > { %v1416_v62 = vsel %vm518_vm1, %v1415_v61, 0.0 }
 0x95a   : > { %1417 = vadd.xlane.f32.xlu1 %v1416_v62 }
 0x9e7   : > { %v1418_v63 = vpop.xlane.xlu1 %1417 }
 0x9e8   : > { %v1419_v1 = vmul.f32 0.03125, %v1418_v63 }
 0x9ea   : > { %v1420_v2 = vadd.f32 1e-05, %v1419_v1 }
 0x9ec   : > { %1799 = vrsqrt.f32 %v1420_v2 }
 0x9f6   : > { %v1800_v4 = vpop.eup %1799 }
 0x9f7   : > { %v1422_v6 = vmul.f32 %v1800_v4, %v1414_v60 }
 0x9f9   : > { %v1429_v8 = vmul.f32 %v1573_v5, %v1422_v6 }
 0x9fb   : > { %v1436_v9 = vadd.f32 %v1574_v7, %v1429_v8 }
 0x9fd   : > { %1437 = vst.msk [vmem:[%s484_s22] sm:$0xff] %vm518_vm1, %v1436_v9 }
 0x9fe   : > { %1842 = shalt.err (!%p1839_p7)
}
 0x9ff   : > { %s1843_s25 = scalar_lea.hbm %s2257_s0, 128  ;;  %s1847_s22 = scalar_lea.hbm %s2314_s14, 256 }
 0xa00   : > { %p1844_p8 = scmp.ne.s32.totalorder %s2257_s0, %s1843_s25  ;;  %p1848_p1 = scmp.lt.u32.totalorder %s2257_s0, %s2314_s14 }
 0xa01   : > { %p1849_p0 = scmp.lt.u32.totalorder %s1847_s22, %s1843_s25  ;;  %p1851_p6 = scmp.lt.u32.totalorder %s1843_s25, %s2257_s0 }
 0xa02   : > { %p1845_p11 = pnand %p1844_p8, %p2335_p9 }
 0xa03   : > { %p1850_p5 = por %p1849_p0, %p1848_p1 }
 0xa04   : > { %p1846_p13 = pneg %p1845_p11 }
 0xa05   : > { %p1852_p10 = por %p1851_p6, %p1850_p5 }
 0xa07   : > { %p1853_p12 = pnand %p1852_p10, %p1846_p13 }
 0xa09   : > { %1856 = shalt.err (!%p1853_p12)
}
 0xa0a   : > { %1718 = dma.vmem_to_hbm [thread:$0]  (%p2335_p9), %s2259_s18, 128, %s2257_s0, %s1439_s28  }
 0xa0b PF: > { %s2336_s21 = sld [smem:[#allocation11_spill]]  ;;  %p1730_p2 = scmp.ge.s32.totalorder %s1895_s16, 2 }
 0xa0c   : > { %s1464_s17 = sand.u32 1, %s1883_s29  }
 0xa0d   : > { %s1465_s27 = scalar_lea.sflag [#allocation4], %s1464_s17 }
 0xa11   : > { %p2337_p3 = scmp.ne.s32.totalorder %s2336_s21, 0 }
 0xa13   : > { %p1725_p4 = pnand %p1730_p2, %p2337_p3 }
 0xa15   : > { %1878 = dma.done.wait (!%p1725_p4), %s1465_s27, 128  }
 0xa16   : > { %1880 = vsyncadd (!%p1725_p4), %s1465_s27, 4294967168  ;;  %s2338_s16 = sld [smem:[#allocation9_spill]]  ;;  %s2339_s26 = sld [smem:[#allocation8_spill]] }
 0xa17   : > { %s2340_s15 = sld [smem:[#allocation10_spill]]  ;;  %s2341_s29 = smov %s1887_s30 }
 0xa1c   : > { %p25_p7 = scmp.ge.s32.totalorder %s2338_s16, 4   ;;  %s2342_s30 = smov %s2339_s26 }
 0xa1e   :  { %27 = sbr.rel (!%p25_p7) target bundleno = 6 (0x6), region = 122 }
 0xa25   :  { %1470 = vsyncpa [#allocation3], 1 }
 0xa26   :  { %1472 = vsyncpa [#allocation3 + $0x1], 1 }
 0xa27   :  { %1473 = vsyncpa [#allocation4], 1 }
 0xa28   :  { %1475 = vsyncpa [#allocation4 + $0x1], 1 }

// kernel: tpu_custom_call.1
= control target key start
LH: loop header
LB: loop body
LE: loop exit
PB: predicated region body
PF: predicated region fallthrough
CT: control target
= control target key end

     0   :  { %s2300_s0 = inlined_call_operand.vmem [shape: f32[2,8,32], index: 0, kind: input, shape index: {}]   ;;  %s2301_s1 = inlined_call_operand.vmem [shape: f32[2,1,8], index: 1, kind: input, shape index: {}]   ;;  %s2302_s2 = inlined_call_operand.vmem [shape: bf16[32,96], index: 2, kind: input, shape index: {}]   ;;  %s2303_s3 = inlined_call_operand.vmem [shape: f32[1,96], index: 3, kind: input, shape index: {}]   ;;  %s2304_s4 = inlined_call_operand.vmem [shape: bf16[4,8,32], index: 4, kind: input, shape index: {}]   ;;  %s2305_s5 = inlined_call_operand.vmem [shape: f32[1,32], index: 5, kind: input, shape index: {}]   ;;  %s2306_s6 = inlined_call_operand.vmem [shape: f32[1,32], index: 6, kind: input, shape index: {}]   ;;  %s2307_s7 = inlined_call_operand.vmem [shape: f32[1,32], index: 7, kind: input, shape index: {}]   ;;  %s2308_s8 = inlined_call_operand.hbm [shape: bf16[32,64], index: 8, kind: input, shape index: {}]   ;;  %s2309_s9 = inlined_call_operand.vmem [shape: f32[1,64], index: 9, kind: input, shape index: {}]   ;;  %s2310_s10 = inlined_call_operand.vmem [shape: bf16[64,32], index: 10, kind: input, shape index: {}]   ;;  %s2311_s11 = inlined_call_operand.vmem [shape: f32[1,32], index: 11, kind: input, shape index: {}]   ;;  %s2312_s12 = inlined_call_operand.vmem [shape: f32[1,32], index: 12, kind: input, shape index: {}]   ;;  %s2313_s13 = inlined_call_operand.vmem [shape: f32[1,32], index: 13, kind: input, shape index: {}]   ;;  %s2314_s14 = inlined_call_operand.hbm [shape: f32[2,8,32], index: 14, kind: output, shape index: {}]  }
   0x1   :  { %2322 = sst [smem:[#allocation12_spill]] %s2300_s0 }
   0x2   :  { %19 = vsyncpa [#allocation3], 0 }
   0x3   :  { %20 = vsyncpa [#allocation4], 0 }
   0x4   :  { %22 = vsyncpa [#allocation4 + $0x1], 0  ;;  %s1983_s29 = smov 0   ;;  %s1985_s30 = smov 0  }
   0x5   :  { %s1987_s15 = smov 0   ;;  %s1989_s16 = smov 0  }
   0x6 LB: > { %2323 = sst [smem:[#allocation8_spill]] %s1891_s15  ;;  %s2004_s17 = sadd.s32 4294967295, %s1895_s16   ;;  %s1895_s16 = sphi %s1989_s16, %s2338_s16   ;;  %s1891_s15 = sphi %s1987_s15, %s2340_s15   ;;  %s1887_s30 = sphi %s1985_s30, %s2342_s30   ;;  %s1883_s29 = sphi %s1983_s29, %s2341_s29  }
   0x7   : > { %s1532_s18 = sadd.s32 4294967294, %s1895_s16   ;;  %s2008_s19 = sadd.s32 1, %s1895_s16  }
   0x8   : > { %2324 = sst [smem:[#allocation9_spill]] %s2008_s19  ;;  %s339_s20 = sadd.s32 1, %s1891_s15 }
   0x9   : > { %s336_s21 = ssub.s32 %s1895_s16, %s2008_s19  ;;  %p349_p0 = scmp.ne.s32.totalorder %s1891_s15, %s1887_s30 }
   0xa   : > { %p337_p1 = scmp.eq.s32.totalorder %s336_s21, 0  ;;  %p350_p2 = scmp.eq.s32.totalorder %s2004_s17, 1 }
   0xb   : > { %p355_p3 = scmp.ne.s32.totalorder %s1887_s30, %s1883_s29  ;;  %p356_p4 = scmp.eq.s32.totalorder %s1532_s18, 1 }
   0xc   : > { %s2019_s22 = scalar_select %p337_p1, %s1891_s15, %s339_s20  }
   0xd   : > { %p2021_p5 = por %p350_p2, %p349_p0  ;;  %p2025_p6 = por %p356_p4, %p355_p3 }
   0xe   : > { %2325 = sst [smem:[#allocation10_spill]] %s2019_s22  ;;  %p1533_p7 = scmp.ge.s32.totalorder %s1895_s16, 1 }
   0xf   : > { %s2326_s23 = scalar_select %p2021_p5, 1, 0 }
  0x10   : > { %s2327_s24 = scalar_select %p2025_p6, 1, 0 }
  0x11   : > { %p363_p8 = scmp.lt.s32.totalorder %s1895_s16, 3  ;;  %p2319_p9 = scmp.eq.s32.totalorder %s2004_s17, 0 }
  0x12   : > { %2328 = sst [smem:[#allocation11_spill]] %s2327_s24  ;;  %s1897_s26 = smov [#allocation2]  }
  0x13   : > { %p2032_p10 = pnand %p1533_p7, %p363_p8  ;;  %s393_s27 = sshll.u32 %s1897_s26, 4  ;;  %s394_s27 = int_to_ptr.vmem [resolvable:$true] %s393_s27 }
  0x14   : > { %s1801_s21 = scalar_lea.hbm %s2308_s8, 256 }
  0x15   : > { %s2329_s25 = scalar_select %p2032_p10, 1, 0 }
  0x16   : > { %p1720_p11 = pneg %p2032_p10  ;;  %p1802_p13 = scmp.ne.s32.totalorder %s2308_s8, %s1801_s21 }
  0x17   : > { %p1808_p3 = scmp.lt.u32.totalorder %s1801_s21, %s2308_s8 }
  0x18   : > { %p2040_p12 = pnand %p2319_p9, %p1720_p11 }
  0x1a   : > { %p1803_p0 = pneg %p2040_p12 }
  0x1c   : > { %p1804_p1 = pnand %p1803_p0, %p1802_p13 }
  0x1e   : > { %p1805_p2 = pneg %p1804_p1 }
  0x20   : > { %p1810_p4 = pnand %p1808_p3, %p1805_p2 }
  0x22   : > { %1813 = shalt.err (!%p1810_p4)
}
  0x23   : > { %s1814_s24 = scalar_lea.vmem %s394_s27, 256  ;;  %p1822_p9 = scmp.lt.s32.totalorder %s394_s27, %s394_s27 }
  0x24   : > { %p1815_p7 = scmp.ne.s32.totalorder %s394_s27, %s1814_s24  ;;  %p1823_p6 = scmp.lt.s32.totalorder %s1814_s24, %s1814_s24 }
  0x26   : > { %p1817_p8 = pnand %p1815_p7, %p1803_p0  ;;  %p1824_p5 = por %p1823_p6, %p1822_p9 }
  0x28   : > { %p1818_p11 = pneg %p1817_p8 }
  0x2a   : > { %p1825_p10 = pnand %p1824_p5, %p1818_p11 }
  0x2c   : > { %1828 = shalt.err (!%p1825_p10)
}
  0x2d   : > { %s1898_s15 = smov 64   ;;  %s1899_s22 = smov 4  }
  0x2e   : > { %1723 = dma.hbm_to_vmem [thread:$0]  (!%p2040_p12), %s2308_s8, 256, %s394_s27, [#allocation3], %s1898_s15, %s1898_s15, %s1899_s22  }
  0x2f   : > { %p2331_p13 = scmp.ne.s32.totalorder %s2329_s25, 0 }
  0x30   : > { %p2332_p1 = scmp.eq.s32.totalorder (!%p2331_p13), %s2004_s17, 0 }
  0x31   : > { %437 = sbr.rel (%p2331_p13) target bundleno = 2571 (0xa0b), region = 76 }
  0x38   : > { %1874 = dma.done.wait (%p2332_p1), [#allocation3], 256   ;;  %p2333_p0 = pmov %p2332_p1 }
  0x39   : > { %p485_p5 = scmp.lt.s32.totalorder %s2004_s17, 1  ;;  %v1900_v0 = vmov 0.0   ;;  %vm1901_vm0 = vmmov 0   ;;  %s2334_s0 = sld [smem:[#allocation12_spill]]  ;;  %v1773_v1 = vld [vmem:[%s2302_s2] sm:$0xff]   ;;  %v1774_v2 = vld [vmem:[%s2302_s2 + $0x8] sm:$0xff]  }
  0x3a   : > { %1876 = vsyncadd (%p2333_p0), [#allocation3], 4294967040  ;;  %1614 = vmatprep.subr.bf16.mxu1 %v1900_v0  ;;  %1618 = vmatprep.mubr.msk.bf16.mxu1 %vm1901_vm0, %v1900_v0  ;;  %vm518_vm1 = vcmask 261120   ;;  %v1540_v5 = vld [vmem:[%s2303_s3] ss:$0 sm:$0xff]  ;;  %s1903_s25 = smov 120  }
  0x3b   : > { %s2071_s19 = scalar_select %p485_p5, %s2004_s17, 1  ;;  %1628 = vmatprep.subr.bf16.mxu0 %v1900_v0  ;;  %1630 = vmatprep.mubr.msk.bf16.mxu0 %vm1901_vm0, %v1900_v0  ;;  %vm573_vm2 = vcmask 64512   ;;  %vm831_vm3 = vcmask 1043456   ;;  %vm1363_vm4 = vcmask 523264  }
  0x3c   : > { %1615 = vmatpush3.bf16.msra.mxu1 %v1773_v1  ;;  %s1904_s27 = smov 96   ;;  %p2335_p9 = scmp.ne.s32.totalorder %s2326_s23, 0 }
  0x3d   : > { %s1539_s24 = sshll.u32 %s2071_s19, 3  ;;  %1616 = vmatprep.subr.bf16.mxu1 %v1900_v0  ;;  %s491_s15 = scalar_lea.vmem %s2301_s1, %s2071_s19 }
  0x3e   : > { %v1548_v24 = vld [vmem:[%s491_s15] ss:$0 sm:$0xff]  ;;  %s1906_s19 = smov 64  }
  0x3f   : > { %s488_s28 = scalar_lea.vmem %s2334_s0, %s1539_s24  ;;  %s1902_s24 = smov 104  }
  0x40   : > { %v2086_v3 = vld [vmem:[%s488_s28] sm:$0xff]  ;;  %1617 = vmatpush3.bf16.msra.mxu1 %v1774_v2  ;;  %s1905_s28 = smov 112  }
  0x41   : > { %v494_v4 = vpack.c.bf16 %v2086_v3, %v2086_v3  ;;  %1622 = vmatprep.subr.bf16.mxu1 %v1900_v0 }
  0x43   : > { %1619 = vmatmul.mubr.msk.bf16.vlgmr.msra.gmra.mrb[0].mxu1 %vm518_vm1, %v494_v4 }
  0x44   : > { %1624 = vmatprep.mubr.msk.bf16.mxu1 %vm1901_vm0, %v1900_v0 }
 0x116   : > { %v556_v6 = vpop.f32.mrb[0].mxu1 }
 0x117   : > { %v557_v7 = vadd.f32 %v1540_v5, %v556_v6  ;;  %v1620_v8 = vpop.f32.mrb[1].mxu1 }
 0x118   : > { %v559_v9 = vpop.f32.mrb[2].mxu1 }
 0x119   : > { %v2098_v10 = vpack.c.bf16 %v557_v7, %v557_v7  ;;  %v1621_v11 = vpop.f32.mrb[3].mxu1 }
 0x11b   : > { %568 = vrot.lane.b32.xlu1 %v2098_v10, %s1902_s24  ;;  %564 = vrot.lane.b32.xlu0 %v2098_v10, %s1903_s25  ;;  %s482_s25 = sand.u32 1, %s1887_s30  }
 0x11f   : > { %571 = vrot.lane.b32.xlu1 %v2098_v10, %s1904_s27  ;;  %566 = vrot.lane.b32.xlu0 %v2098_v10, %s1905_s28  ;;  %s1439_s28 = scalar_lea.sflag [#allocation4], %s482_s25 }
 0x18d   : > { %v2104_v12 = vpop.permute.xlu1 %568  ;;  %v2106_v13 = vpop.permute.xlu0 %564 }
 0x18e   : > { %620 = vrot.lane.b32.xlu0 %v2106_v13, %s1904_s27 }
 0x191   : > { %v572_v14 = vpop.permute.xlu1 %571  ;;  %v2109_v15 = vpop.permute.xlu0 %566 }
 0x192   : > { %v578_v16 = vsel %vm573_vm2, %v572_v14, 0  ;;  %716 = vrot.lane.b32.xlu0 %v2104_v12, %s1904_s27  ;;  %668 = vrot.lane.b32.xlu1 %v2109_v15, %s1904_s27  ;;  %s1538_s27 = sshll.u32 %s482_s25, 3 }
 0x193   : > { %1623 = vmatpush3.bf16.xpose.msra.mxu1 %v578_v16  ;;  %s484_s22 = scalar_lea.vmem [#allocation5], %s1538_s27 }
 0x194   : > { %1634 = vmatprep.subr.bf16.mxu1 %v1900_v0  ;;  %s1452_s18 = sshll.u32 %s484_s22, 4  ;;  %s2259_s18 = int_to_ptr.vmem [resolvable:$true] %s1452_s18 }
 0x195   : > { %s1829_s21 = scalar_lea.vmem %s2259_s18, 128 }
 0x196   : > { %p1830_p6 = scmp.ne.s32.totalorder %s2259_s18, %s1829_s21 }
 0x198   : > { %p1831_p10 = pnand %p1830_p6, %p2335_p9 }
 0x19a   : > { %1625 = vmatmul.mubr.msk.bf16.vlgmr.msra.gmra.mrb[4].mxu1 %vm573_vm2, %v2098_v10  ;;  %p1832_p12 = pneg %p1831_p10 }
 0x19b   : > { %1636 = vmatprep.mubr.msk.bf16.mxu1 %vm1901_vm0, %v1900_v0 }
 0x200   : > { %v621_v17 = vpop.permute.xlu0 %620 }
 0x201   : > { %v626_v18 = vsel %vm573_vm2, %v621_v17, 0 }
 0x202   : > { %1629 = vmatpush3.bf16.xpose.msra.mxu0 %v626_v18 }
 0x203   : > { %1640 = vmatprep.subr.bf16.mxu0 %v1900_v0 }
 0x204   : > { %v669_v19 = vpop.permute.xlu1 %668  ;;  %v717_v21 = vpop.permute.xlu0 %716 }
 0x205   : > { %v674_v20 = vsel %vm573_vm2, %v669_v19, 0  ;;  %v722_v22 = vsel %vm573_vm2, %v717_v21, 0 }
 0x206   : > { %1635 = vmatpush3.bf16.xpose.msra.mxu1 %v674_v20 }
 0x207   : > { %1646 = vmatprep.subr.bf16.mxu1 %v1900_v0 }
 0x209   : > { %1631 = vmatmul.mubr.msk.bf16.vlgmr.msra.gmra.mrb[0].mxu0 %vm573_vm2, %v2106_v13 }
 0x20a   : > { %1641 = vmatpush3.bf16.xpose.msra.mxu0 %v722_v22  ;;  %1642 = vmatprep.mubr.msk.bf16.mxu0 %vm1901_vm0, %v1900_v0 }
 0x20b   : > { %1652 = vmatprep.subr.bf16.mxu0 %v1900_v0 }
 0x20d   : > { %1637 = vmatmul.mubr.msk.bf16.vlgmr.msra.gmra.mrb[8].mxu1 %vm573_vm2, %v2109_v15 }
 0x20e   : > { %1648 = vmatprep.mubr.msk.bf16.mxu1 %vm1901_vm0, %v1900_v0 }
 0x211   : > { %1643 = vmatmul.mubr.msk.bf16.vlgmr.msra.gmra.mrb[4].mxu0 %vm573_vm2, %v2104_v12 }
 0x212   : > { %1654 = vmatprep.mubr.msk.bf16.mxu0 %vm1901_vm0, %v1900_v0 }
 0x26d   : > { %v614_v23 = vpop.f32.mrb[4].mxu1 }
 0x26e   : > { %v764_v25 = vmul.f32 0.35355338, %v614_v23  ;;  %v1626_v26 = vpop.f32.mrb[5].mxu1 }
 0x26f   : > { %v617_v27 = vpop.f32.mrb[6].mxu1 }
 0x270   : > { %v1627_v28 = vpop.f32.mrb[7].mxu1  ;;  %v774_v29 = vadd.f32 %v1548_v24, %v764_v25 }
 0x271   : > { %v1553_v28 = vld [vmem:[%s2304_s4 + $0x4] sm:$0xf] }
 0x272   : > { %v778_v30 = vsel %vm573_vm2, %v774_v29, -inf }
 0x273   : > { %779 = vmax.xlane.f32.xlu1 %v778_v30 }
 0x2dc   : > { %v662_v31 = vpop.f32.mrb[0].mxu0 }
 0x2dd   : > { %v765_v32 = vmul.f32 0.35355338, %v662_v31  ;;  %v1632_v33 = vpop.f32.mrb[1].mxu0 }
 0x2de   : > { %v665_v34 = vpop.f32.mrb[2].mxu0 }
 0x2df   : > { %v1633_v35 = vpop.f32.mrb[3].mxu0  ;;  %v775_v36 = vadd.f32 %v1548_v24, %v765_v32  ;;  %v1030_v32 = vsel %vm831_vm3, %v1553_v28, 0  ;;  %v1023_v34 = vld [vmem:[%s2304_s4] sm:$0xf] }
 0x2e0   : > { %v710_v37 = vpop.f32.mrb[8].mxu1  ;;  %v1775_v28 = vld [vmem:[#allocation2] sm:$0xff]  }
 0x2e1   : > { %v766_v38 = vmul.f32 0.35355338, %v710_v37  ;;  %v1638_v39 = vpop.f32.mrb[9].mxu1  ;;  %v781_v40 = vsel %vm573_vm2, %v775_v36, -inf  ;;  %v1076_v37 = vsel %vm831_vm3, %v1023_v34, 0 }
 0x2e2   : > { %782 = vmax.xlane.f32.xlu0 %v781_v40  ;;  %v713_v41 = vpop.f32.mrb[10].mxu1 }
 0x2e3   : > { %v1639_v42 = vpop.f32.mrb[11].mxu1  ;;  %v776_v43 = vadd.f32 %v1548_v24, %v766_v38  ;;  %v1558_v38 = vld [vmem:[%s2304_s4 + $0xc] sm:$0xf] }
 0x2e4   : > { %v758_v44 = vpop.f32.mrb[4].mxu0  ;;  %v1173_v42 = vsel %vm831_vm3, %v1558_v38, 0 }
 0x2e5   : > { %v767_v45 = vmul.f32 0.35355338, %v758_v44  ;;  %v1644_v46 = vpop.f32.mrb[5].mxu0  ;;  %v784_v47 = vsel %vm573_vm2, %v776_v43, -inf }
 0x2e6   : > { %v761_v48 = vpop.f32.mrb[6].mxu0  ;;  %785 = vmax.xlane.f32.xlu0 %v784_v47 }
 0x2e7   : > { %v1645_v49 = vpop.f32.mrb[7].mxu0  ;;  %v777_v50 = vadd.f32 %v1548_v24, %v767_v45  ;;  %v1556_v45 = vld [vmem:[%s2304_s4 + $0x8] sm:$0xf] }
 0x2e8   : > { %v1124_v49 = vsel %vm831_vm3, %v1556_v45, 0 }
 0x2e9   : > { %v787_v51 = vsel %vm573_vm2, %v777_v50, -inf }
 0x2ea   : > { %788 = vmax.xlane.f32.xlu1 %v787_v51 }
 0x2fb   : > { %875 = vrot.lane.b32.xlu1 %v2106_v13, %s1906_s19 }
 0x2fc   : > { %826 = vrot.lane.b32.xlu0 %v2098_v10, %s1906_s19 }
 0x300   : > { %v780_v52 = vpop.xlane.xlu1 %779 }
 0x301   : > { %v790_v53 = vsub.f32 %v774_v29, %v780_v52 }
 0x303   : > { %v794_v54 = vmul.f32 1.442695, %v790_v53 }
 0x305   : > { %1781 = vpow2.f32 %v794_v54 }
 0x30f   : > { %v1782_v55 = vpop.eup %1781 }
 0x310   : > { %v802_v56 = vsel %vm573_vm2, %v1782_v55, 0.0 }
 0x31b   : > { %803 = vadd.xlane.f32.xlu0 %v802_v56 }
 0x36f   : > { %v783_v57 = vpop.xlane.xlu0 %782 }
 0x370   : > { %v791_v58 = vsub.f32 %v775_v36, %v783_v57 }
 0x372   : > { %v796_v59 = vmul.f32 1.442695, %v791_v58 }
 0x373   : > { %v786_v60 = vpop.xlane.xlu0 %785 }
 0x374   : > { %1783 = vpow2.f32 %v796_v59  ;;  %v792_v61 = vsub.f32 %v776_v43, %v786_v60 }
 0x376   : > { %v798_v62 = vmul.f32 1.442695, %v792_v61 }
 0x377   : > { %v789_v63 = vpop.xlane.xlu1 %788  ;;  %v827_v1 = vpop.permute.xlu0 %826 }
 0x378   : > { %1785 = vpow2.f32 %v798_v62  ;;  %v793_v2 = vsub.f32 %v777_v50, %v789_v63  ;;  %v833_v4 = vsel %vm831_vm3, %v827_v1, 0 }
 0x379   : > { %1647 = vmatpush3.bf16.msra.mxu1 %v833_v4 }
 0x37a   : > { %v800_v5 = vmul.f32 1.442695, %v793_v2  ;;  %1658 = vmatprep.subr.bf16.mxu1 %v1900_v0 }
 0x37b   : > { %v876_v6 = vpop.permute.xlu1 %875 }
 0x37c   : > { %1787 = vpow2.f32 %v800_v5  ;;  %v881_v7 = vsel %vm831_vm3, %v876_v6, 0 }
 0x37d   : > { %1653 = vmatpush3.bf16.msra.mxu0 %v881_v7 }
 0x37e   : > { %v1784_v8 = vpop.eup %1783  ;;  %1664 = vmatprep.subr.bf16.mxu0 %v1900_v0 }
 0x37f   : > { %v805_v9 = vsel %vm573_vm2, %v1784_v8, 0.0 }
 0x380   : > { %806 = vadd.xlane.f32.xlu1 %v805_v9 }
 0x382   : > { %v1786_v10 = vpop.eup %1785 }
 0x383   : > { %v808_v11 = vsel %vm573_vm2, %v1786_v10, 0.0 }
 0x384   : > { %809 = vadd.xlane.f32.xlu0 %v808_v11 }
 0x386   : > { %v1788_v13 = vpop.eup %1787 }
 0x387   : > { %v811_v14 = vsel %vm573_vm2, %v1788_v13, 0.0 }
 0x388   : > { %812 = vadd.xlane.f32.xlu1 %v811_v14 }
 0x399   : > { %923 = vrot.lane.b32.xlu1 %v2109_v15, %s1906_s19 }
 0x39a   : > { %971 = vrot.lane.b32.xlu0 %v2104_v12, %s1906_s19  ;;  %s1576_s19 = sshll.u32 %s2004_s17, 7  ;;  %s1907_s17 = smov [#allocation5]  }
 0x39b   : > { %s2257_s0 = scalar_lea.hbm %s2314_s14, %s1576_s19  ;;  %s1833_s27 = sshll.u32 %s1907_s17, 4  ;;  %s1834_s27 = int_to_ptr.vmem [resolvable:$false] %s1833_s27 }
 0x39c   : > { %s1835_s26 = scalar_lea.vmem %s1834_s27, 256  ;;  %p1836_p2 = scmp.lt.s32.totalorder %s2259_s18, %s1834_s27 }
 0x39d   : > { %p1837_p3 = scmp.lt.s32.totalorder %s1835_s26, %s1829_s21 }
 0x39f   : > { %p1838_p4 = por %p1837_p3, %p1836_p2 }
 0x3a1   : > { %p1839_p7 = pnand %p1838_p4, %p1832_p12 }
 0x3a8   : > { %v804_v16 = vpop.xlane.xlu0 %803 }
 0x3a9   : > { %1789 = vrcp.f32 %v804_v16  ;;  %v1560_v16 = vld [vmem:[%s2305_s5] ss:$0 sm:$0xff] }
 0x3b3   : > { %v1790_v17 = vpop.eup %1789 }
 0x3b4   : > { %v818_v18 = vmul.f32 %v1790_v17, %v1782_v55 }
 0x3b6   : > { %v822_v19 = vpack.c.bf16 %v818_v18, %v818_v18 }
 0x3b8   : > { %1649 = vmatmul.mubr.msk.bf16.vlgmr.msra.gmra.mrb[12].mxu1 %vm573_vm2, %v822_v19 }
 0x3b9   : > { %1660 = vmatprep.mubr.msk.bf16.mxu1 %vm1901_vm0, %v1900_v0 }
 0x40d   : > { %v807_v20 = vpop.xlane.xlu1 %806 }
 0x40e   : > { %1791 = vrcp.f32 %v807_v20 }
 0x411   : > { %v810_v21 = vpop.xlane.xlu0 %809 }
 0x412   : > { %1793 = vrcp.f32 %v810_v21 }
 0x415   : > { %v813_v22 = vpop.xlane.xlu1 %812  ;;  %v972_v12 = vpop.permute.xlu0 %971 }
 0x416   : > { %1795 = vrcp.f32 %v813_v22  ;;  %v977_v30 = vsel %vm831_vm3, %v972_v12, 0 }
 0x418   : > { %v1792_v15 = vpop.eup %1791 }
 0x419   : > { %v819_v23 = vmul.f32 %v1792_v15, %v1784_v8  ;;  %v924_v24 = vpop.permute.xlu1 %923 }
 0x41a   : > { %v929_v25 = vsel %vm831_vm3, %v924_v24, 0 }
 0x41b   : > { %1659 = vmatpush3.bf16.msra.mxu1 %v929_v25  ;;  %v823_v26 = vpack.c.bf16 %v819_v23, %v819_v23 }
 0x41c   : > { %v1794_v27 = vpop.eup %1793  ;;  %1670 = vmatprep.subr.bf16.mxu1 %v1900_v0 }
 0x41d   : > { %v820_v29 = vmul.f32 %v1794_v27, %v1786_v10  ;;  %1655 = vmatmul.mubr.msk.bf16.vlgmr.msra.gmra.mrb[8].mxu0 %vm573_vm2, %v823_v26 }
 0x41e   : > { %1665 = vmatpush3.bf16.msra.mxu0 %v977_v30  ;;  %1666 = vmatprep.mubr.msk.bf16.mxu0 %vm1901_vm0, %v1900_v0  ;;  %v1778_v30 = vld [vmem:[%s2310_s10 + $0x8] sm:$0xff]  }
 0x41f   : > { %v824_v31 = vpack.c.bf16 %v820_v29, %v820_v29  ;;  %1676 = vmatprep.subr.bf16.mxu0 %v1900_v0  ;;  %v1776_v29 = vld [vmem:[#allocation2 + $0x8] sm:$0xff]  }
 0x420   : > { %v1796_v33 = vpop.eup %1795 }
 0x421   : > { %v821_v35 = vmul.f32 %v1796_v33, %v1788_v13  ;;  %1661 = vmatmul.mubr.msk.bf16.vlgmr.msra.gmra.mrb[16].mxu1 %vm573_vm2, %v824_v31 }
 0x422   : > { %1671 = vmatpush3.bf16.msra.mxu1 %v1030_v32  ;;  %1672 = vmatprep.mubr.msk.bf16.mxu1 %vm1901_vm0, %v1900_v0 }
 0x423   : > { %v825_v36 = vpack.c.bf16 %v821_v35, %v821_v35  ;;  %1682 = vmatprep.subr.bf16.mxu1 %v1900_v0  ;;  %v1561_v35 = vld [vmem:[%s2306_s6] ss:$0 sm:$0xff] }
 0x425   : > { %1667 = vmatmul.mubr.msk.bf16.vlgmr.msra.gmra.mrb[12].mxu0 %vm573_vm2, %v825_v36 }
 0x426   : > { %1677 = vmatpush3.bf16.msra.mxu0 %v1076_v37  ;;  %1678 = vmatprep.mubr.msk.bf16.mxu0 %vm1901_vm0, %v1900_v0  ;;  %v1562_v37 = vld [vmem:[%s2307_s7] ss:$0 sm:$0xff] }
 0x427   : > { %1688 = vmatprep.subr.bf16.mxu0 %v1900_v0 }
 0x48b   : > { %v869_v39 = vpop.f32.mrb[12].mxu1 }
 0x48c   : > { %v1019_v40 = vpack.c.bf16 %v869_v39, %v869_v39  ;;  %v1650_v41 = vpop.f32.mrb[13].mxu1 }
 0x48d   : > { %v872_v43 = vpop.f32.mrb[14].mxu1  ;;  %v1779_v41 = vld [vmem:[%s2310_s10 + $0x10] sm:$0xff]  }
 0x48e   : > { %v1651_v44 = vpop.f32.mrb[15].mxu1  ;;  %1679 = vmatmul.mubr.msk.bf16.vlgmr.msra.gmra.mrb[16].mxu0 %vm573_vm2, %v1019_v40  ;;  %v1563_v43 = vld [vmem:[%s2309_s9] ss:$0 sm:$0xff] }
 0x48f   : > { %1689 = vmatpush3.bf16.msra.mxu0 %v1173_v42  ;;  %1690 = vmatprep.mubr.msk.bf16.mxu0 %vm1901_vm0, %v1900_v0  ;;  %v1780_v42 = vld [vmem:[%s2310_s10 + $0x18] sm:$0xff]  }
 0x490   : > { %1702 = vmatprep.subr.bf16.mxu0 %v1900_v0 }
 0x4f0   : > { %v917_v46 = vpop.f32.mrb[8].mxu0 }
 0x4f1   : > { %v1020_v47 = vpack.c.bf16 %v917_v46, %v917_v46  ;;  %v1656_v48 = vpop.f32.mrb[9].mxu0 }
 0x4f2   : > { %v920_v50 = vpop.f32.mrb[10].mxu0 }
 0x4f3   : > { %v1657_v51 = vpop.f32.mrb[11].mxu0  ;;  %1673 = vmatmul.mubr.msk.bf16.vlgmr.msra.gmra.mrb[20].mxu1 %vm573_vm2, %v1020_v47 }
 0x4f4   : > { %1683 = vmatpush3.bf16.msra.mxu1 %v1124_v49  ;;  %v965_v52 = vpop.f32.mrb[16].mxu1  ;;  %1684 = vmatprep.mubr.msk.bf16.mxu1 %vm1901_vm0, %v1900_v0 }
 0x4f5   : > { %v1662_v53 = vpop.f32.mrb[17].mxu1  ;;  %1694 = vmatprep.subr.bf16.mxu1 %v1900_v0  ;;  %v1021_v57 = vpack.c.bf16 %v965_v52, %v965_v52 }
 0x4f6   : > { %v968_v54 = vpop.f32.mrb[18].mxu1 }
 0x4f7   : > { %v1663_v55 = vpop.f32.mrb[19].mxu1 }
 0x4f8   : > { %v1013_v56 = vpop.f32.mrb[12].mxu0 }
 0x4f9   : > { %v1022_v58 = vpack.c.bf16 %v1013_v56, %v1013_v56  ;;  %v1668_v59 = vpop.f32.mrb[13].mxu0 }
 0x4fa   : > { %v1016_v60 = vpop.f32.mrb[14].mxu0 }
 0x4fb   : > { %v1669_v61 = vpop.f32.mrb[15].mxu0  ;;  %1685 = vmatmul.mubr.msk.bf16.vlgmr.msra.gmra.mrb[24].mxu1 %vm573_vm2, %v1021_v57  ;;  %1691 = vmatmul.mubr.msk.bf16.vlgmr.msra.gmra.mrb[20].mxu0 %vm573_vm2, %v1022_v58 }
 0x4fc   : > { %1698 = vmatprep.mubr.msk.bf16.mxu1 %vm1901_vm0, %v1900_v0  ;;  %1710 = vmatprep.mubr.msk.bf16.mxu0 %vm1901_vm0, %v1900_v0 }
 0x4fd   : > { %1695 = vmatpush3.bf16.msra.mxu1 %v1775_v28 }
 0x4fe   : > { %1696 = vmatprep.subr.bf16.mxu1 %v1900_v0 }
 0x501   : > { %1697 = vmatpush3.bf16.msra.mxu1 %v1776_v29 }
 0x561   : > { %v1112_v62 = vpop.f32.mrb[16].mxu0 }
 0x562   : > { %v1680_v63 = vpop.f32.mrb[17].mxu0 }
 0x563   : > { %v1115_v1 = vpop.f32.mrb[18].mxu0 }
 0x564   : > { %v1681_v2 = vpop.f32.mrb[19].mxu0 }
 0x5c6   : > { %v1066_v4 = vpop.f32.mrb[20].mxu1 }
 0x5c7   : > { %v1113_v5 = vadd.f32 %v1112_v62, %v1066_v4  ;;  %v1674_v6 = vpop.f32.mrb[21].mxu1 }
 0x5c8   : > { %v1069_v7 = vpop.f32.mrb[22].mxu1 }
 0x5c9   : > { %v1675_v8 = vpop.f32.mrb[23].mxu1  ;;  %v1574_v7 = vld [vmem:[%s2313_s13] ss:$0 sm:$0xff] }
 0x5ce   : > { %v1160_v9 = vpop.f32.mrb[24].mxu1  ;;  %v1209_v10 = vpop.f32.mrb[20].mxu0 }
 0x5cf   : > { %v1166_v11 = vadd.f32 %v1160_v9, %v1113_v5  ;;  %v1686_v13 = vpop.f32.mrb[25].mxu1  ;;  %v1692_v14 = vpop.f32.mrb[21].mxu0  ;;  %v1573_v5 = vld [vmem:[%s2312_s12] ss:$0 sm:$0xff] }
 0x5d0   : > { %v1163_v17 = vpop.f32.mrb[26].mxu1  ;;  %v1212_v18 = vpop.f32.mrb[22].mxu0 }
 0x5d1   : > { %v1215_v19 = vadd.f32 %v1209_v10, %v1166_v11  ;;  %v1687_v20 = vpop.f32.mrb[27].mxu1  ;;  %v1693_v21 = vpop.f32.mrb[23].mxu0 }
 0x5d3   : > { %v1223_v22 = vadd.f32 %v1560_v16, %v1215_v19 }
 0x5d5   : > { %v1224_v15 = vadd.f32 %v1223_v22, %v2086_v3  ;;  %v1777_v3 = vld [vmem:[%s2310_s10] sm:$0xff]  }
 0x5d6   : > { %1703 = vmatpush3.bf16.msra.mxu0 %v1777_v3 }
 0x5d7   : > { %v1227_v23 = vsel %vm518_vm1, %v1224_v15, 0.0  ;;  %1704 = vmatprep.subr.bf16.mxu0 %v1900_v0 }
 0x5d8   : > { %1228 = vadd.xlane.f32.xlu1 %v1227_v23 }
 0x5da   : > { %1705 = vmatpush3.bf16.msra.mxu0 %v1778_v30 }
 0x5db   : > { %1706 = vmatprep.subr.bf16.mxu0 %v1900_v0 }
 0x5de   : > { %1707 = vmatpush3.bf16.msra.mxu0 %v1779_v41 }
 0x5df   : > { %1708 = vmatprep.subr.bf16.mxu0 %v1900_v0  ;;  %v1567_v0 = vld [vmem:[%s2311_s11] ss:$0 sm:$0xff] }
 0x5e2   : > { %1709 = vmatpush3.bf16.msra.mxu0 %v1780_v42 }
 0x665   : > { %v1229_v24 = vpop.xlane.xlu1 %1228 }
 0x666   : > { %v1231_v12 = vmul.f32 0.03125, %v1229_v24 }
 0x668   : > { %v1232_v25 = vsub.f32 %v1224_v15, %v1231_v12 }
 0x66a   : > { %v1233_v26 = vmul.f32 %v1232_v25, %v1232_v25 }
 0x66c   : > { %v1234_v27 = vsel %vm518_vm1, %v1233_v26, 0.0 }
 0x66d   : > { %1235 = vadd.xlane.f32.xlu0 %v1234_v27 }
 0x6fa   : > { %v1236_v31 = vpop.xlane.xlu0 %1235 }
 0x6fb   : > { %v1237_v32 = vmul.f32 0.03125, %v1236_v31 }
 0x6fd   : > { %v1238_v33 = vadd.f32 1e-05, %v1237_v32 }
 0x6ff   : > { %1797 = vrsqrt.f32 %v1238_v33 }
 0x709   : > { %v1798_v34 = vpop.eup %1797 }
 0x70a   : > { %v1240_v36 = vmul.f32 %v1798_v34, %v1232_v25 }
 0x70c   : > { %v1247_v38 = vmul.f32 %v1561_v35, %v1240_v36 }
 0x70e   : > { %v1254_v39 = vadd.f32 %v1562_v37, %v1247_v38 }
 0x710   : > { %v1255_v40 = vpack.c.bf16 %v1254_v39, %v1254_v39 }
 0x712   : > { %1699 = vmatmul.mubr.msk.bf16.vlgmr.msra.gmra.mrb[28].mxu1 %vm518_vm1, %v1255_v40 }
 0x7e5   : > { %v1316_v44 = vpop.f32.mrb[28].mxu1 }
 0x7e6   : > { %v1317_v45 = vadd.f32 %v1563_v43, %v1316_v44  ;;  %v1700_v46 = vpop.f32.mrb[29].mxu1 }
 0x7e7   : > { %v1319_v47 = vpop.f32.mrb[30].mxu1 }
 0x7e8   : > { %v1322_v48 = vmax.f32 %v1317_v45, 0.0  ;;  %v1701_v49 = vpop.f32.mrb[31].mxu1 }
 0x7ea   : > { %v1323_v50 = vpack.c.bf16 %v1322_v48, %v1322_v48 }
 0x7ec   : > { %1711 = vmatmul.mubr.msk.bf16.vlgmr.msra.gmra.mrb[24].mxu0 %vm1363_vm4, %v1323_v50 }
 0x8bf   : > { %v1401_v51 = vpop.f32.mrb[24].mxu0 }
 0x8c0   : > { %v1402_v52 = vadd.f32 %v1567_v0, %v1401_v51  ;;  %v1712_v53 = vpop.f32.mrb[25].mxu0 }
 0x8c1   : > { %v1404_v54 = vpop.f32.mrb[26].mxu0 }
 0x8c2   : > { %v1713_v55 = vpop.f32.mrb[27].mxu0  ;;  %v1407_v56 = vadd.f32 %v1402_v52, %v1254_v39 }
 0x8c4   : > { %v1410_v57 = vsel %vm518_vm1, %v1407_v56, 0.0 }
 0x8c5   : > { %1411 = vadd.xlane.f32.xlu0 %v1410_v57 }
 0x952   : > { %v1412_v58 = vpop.xlane.xlu0 %1411 }
 0x953   : > { %v1413_v59 = vmul.f32 0.03125, %v1412_v58 }
 0x955   : > { %v1414_v60 = vsub.f32 %v1407_v56, %v1413_v59 }
 0x957   : > { %v1415_v61 = vmul.f32 %v1414_v60, %v1414_v60 }
 0x959   : > { %v1416_v62 = vsel %vm518_vm1, %v1415_v61, 0.0 }
 0x95a   : > { %1417 = vadd.xlane.f32.xlu1 %v1416_v62 }
 0x9e7   : > { %v1418_v63 = vpop.xlane.xlu1 %1417 }
 0x9e8   : > { %v1419_v1 = vmul.f32 0.03125, %v1418_v63 }
 0x9ea   : > { %v1420_v2 = vadd.f32 1e-05, %v1419_v1 }
 0x9ec   : > { %1799 = vrsqrt.f32 %v1420_v2 }
 0x9f6   : > { %v1800_v4 = vpop.eup %1799 }
 0x9f7   : > { %v1422_v6 = vmul.f32 %v1800_v4, %v1414_v60 }
 0x9f9   : > { %v1429_v8 = vmul.f32 %v1573_v5, %v1422_v6 }
 0x9fb   : > { %v1436_v9 = vadd.f32 %v1574_v7, %v1429_v8 }
 0x9fd   : > { %1437 = vst.msk [vmem:[%s484_s22] sm:$0xff] %vm518_vm1, %v1436_v9 }
 0x9fe   : > { %1842 = shalt.err (!%p1839_p7)
}
 0x9ff   : > { %s1843_s25 = scalar_lea.hbm %s2257_s0, 128  ;;  %s1847_s22 = scalar_lea.hbm %s2314_s14, 256 }
 0xa00   : > { %p1844_p8 = scmp.ne.s32.totalorder %s2257_s0, %s1843_s25  ;;  %p1848_p1 = scmp.lt.u32.totalorder %s2257_s0, %s2314_s14 }
 0xa01   : > { %p1849_p0 = scmp.lt.u32.totalorder %s1847_s22, %s1843_s25  ;;  %p1851_p6 = scmp.lt.u32.totalorder %s1843_s25, %s2257_s0 }
 0xa02   : > { %p1845_p11 = pnand %p1844_p8, %p2335_p9 }
 0xa03   : > { %p1850_p5 = por %p1849_p0, %p1848_p1 }
 0xa04   : > { %p1846_p13 = pneg %p1845_p11 }
 0xa05   : > { %p1852_p10 = por %p1851_p6, %p1850_p5 }
 0xa07   : > { %p1853_p12 = pnand %p1852_p10, %p1846_p13 }
 0xa09   : > { %1856 = shalt.err (!%p1853_p12)
}
 0xa0a   : > { %1718 = dma.vmem_to_hbm [thread:$0]  (%p2335_p9), %s2259_s18, 128, %s2257_s0, %s1439_s28  }
 0xa0b PF: > { %s2336_s21 = sld [smem:[#allocation11_spill]]  ;;  %p1730_p2 = scmp.ge.s32.totalorder %s1895_s16, 2 }
 0xa0c   : > { %s1464_s17 = sand.u32 1, %s1883_s29  }
 0xa0d   : > { %s1465_s27 = scalar_lea.sflag [#allocation4], %s1464_s17 }
 0xa11   : > { %p2337_p3 = scmp.ne.s32.totalorder %s2336_s21, 0 }
 0xa13   : > { %p1725_p4 = pnand %p1730_p2, %p2337_p3 }
 0xa15   : > { %1878 = dma.done.wait (!%p1725_p4), %s1465_s27, 128  }
 0xa16   : > { %1880 = vsyncadd (!%p1725_p4), %s1465_s27, 4294967168  ;;  %s2338_s16 = sld [smem:[#allocation9_spill]]  ;;  %s2339_s26 = sld [smem:[#allocation8_spill]] }
 0xa17   : > { %s2340_s15 = sld [smem:[#allocation10_spill]]  ;;  %s2341_s29 = smov %s1887_s30 }
 0xa1c   : > { %p25_p7 = scmp.ge.s32.totalorder %s2338_s16, 4   ;;  %s2342_s30 = smov %s2339_s26 }
 0xa1e   :  { %27 = sbr.rel (!%p25_p7) target bundleno = 6 (0x6), region = 122 }
 0xa25   :  { %1470 = vsyncpa [#allocation3], 1 }
 0xa26   :  { %1472 = vsyncpa [#allocation3 + $0x1], 1 }
 0xa27   :  { %1473 = vsyncpa [#allocation4], 1 }
 0xa28   :  { %1475 = vsyncpa [#allocation4 + $0x1], 1 }

</bundles_post_ra>
